<compile_context>
chip_gen: v5e
topology: v5e:2x2
jax: 0.10.0
libtpu: 0.0.40
codegen_flags: <defaults>
</compile_context>

<pallas_src>
import functools

import jax
import jax.numpy as jnp
from jax.experimental import pallas as pl
from jax.experimental.pallas import tpu as pltpu

_MIB = 1024 * 1024


def _round_up(x, m):
    return (x + m - 1) // m * m


def _cdiv(a, b):
    return -(-a // b)


def _vmem_capacity_bytes():
    # Per-TensorCore VMEM: 128 MiB on v5e/v6e, 64 MiB on v7x.
    try:
        return int(pltpu.get_tpu_info().vmem_capacity_bytes)
    except Exception:
        return 64 * _MIB  # conservative fallback (v7x per-TC)


def _choose_tiles(bc, h, w, stride, dtype, budget_bytes):
    """Pick (t_bc, t_h) so double-buffered in+out blocks fit `budget_bytes`.

    Footprints account for (sub, 128) sublane/lane padding of the last two
    block dims, with dtype-dependent sublane packing (8 f32 / 16 bf16 / 32 i8).
    Also caps the block so the grid keeps >=4 steps (pipeline overlap) and
    >=2 blocks along BC (v7x megacore sharding).
    """
    itemsize = jnp.dtype(dtype).itemsize
    sub = 8 * max(1, 4 // itemsize)  # sublane multiple for this dtype
    s2w = stride * stride * w

    def footprint(t_bc, t_h):
        in_b = t_bc * _round_up(t_h, sub) * _round_up(w, 128) * itemsize
        out_b = t_bc * _round_up(t_h, sub) * _round_up(s2w, 128) * itemsize
        return 2 * (in_b + out_b)  # x2: Pallas double-buffers each operand

    # t_h: whole feature map if it fits at t_bc=1, else the largest sublane
    # multiple that fits (falling back to full H, which is always legal).
    if footprint(1, h) <= budget_bytes:
        t_h = h
    else:
        t_h = h
        for m in range(_round_up(h, sub) // sub, 0, -1):
            cand = m * sub
            if cand < h and footprint(1, cand) <= budget_bytes:
                t_h = cand
                break
    grid_h = _cdiv(h, t_h)

    per_bc = footprint(1, t_h)
    cap_budget = max(1, budget_bytes // per_bc)
    cap_core = bc if bc < 2 else max(1, bc // 2)           # BC grid axis >= 2
    need_bc_steps = _cdiv(4, grid_h)                        # total steps >= ~4
    cap_steps = max(1, bc // need_bc_steps) if bc >= need_bc_steps else bc
    t_bc = max(1, min(bc, cap_budget, cap_core, cap_steps))
    return t_bc, t_h, footprint(t_bc, t_h)


def _upsample_kernel(x_ref, o_ref, *, stride):
    # x_ref block: (t_bc, t_h, W); o_ref block: (t_bc, t_h, stride*stride*W).
    x = x_ref[...]
    # Lane-axis (W) interleave: output lane w*s + k  <-  input lane w.
    xr = jnp.repeat(x, stride, axis=2)                  # (t_bc, t_h, s*W)
    # H replication is packed into the lane axis of the (BC, H, s*s*W)
    # layout: the s output rows for input row h are s contiguous copies.
    o_ref[...] = jnp.concatenate([xr] * stride, axis=2)  # (t_bc, t_h, s*s*W)


def upsample(x, stride=2):
    assert x.ndim == 4
    assert isinstance(stride, int) and stride >= 1
    if stride == 1:
        return x

    B, C, H, W = x.shape
    bc = B * C
    s2w = stride * stride * W
    x3 = x.reshape(bc, H, W)  # free reshape for contiguous NCHW

    capacity = _vmem_capacity_bytes()
    budget = min(8 * _MIB, max(2 * _MIB, capacity // 16))
    t_bc, t_h, foot = _choose_tiles(bc, H, W, stride, x.dtype, budget)
    grid = (_cdiv(bc, t_bc), _cdiv(H, t_h))
    vmem_limit = int(min(capacity // 2, max(32 * _MIB, 2 * foot)))

    kernel = functools.partial(_upsample_kernel, stride=stride)
    out3 = pl.pallas_call(
        kernel,
        out_shape=jax.ShapeDtypeStruct((bc, H, s2w), x.dtype),
        grid=grid,
        in_specs=[pl.BlockSpec((t_bc, t_h, W), lambda i, j: (i, j, 0))],
        out_specs=pl.BlockSpec((t_bc, t_h, s2w), lambda i, j: (i, j, 0)),
        compiler_params=pltpu.CompilerParams(
            dimension_semantics=("parallel", "parallel"),
            vmem_limit_bytes=vmem_limit,
        ),
    )(x3)
    # (BC, H, s*s*W) row-major == (B, C, H*s, W*s) row-major: free reshape.
    return out3.reshape(B, C, H * stride, W * stride)


def upsample_ref(x, stride=2):
    # Pure-JAX reference mirroring the PyTorch view/expand/view semantics.
    B, C, H, W = x.shape
    x = x.reshape(B, C, H, 1, W, 1)
    x = jnp.broadcast_to(x, (B, C, H, stride, W, stride))
    return x.reshape(B, C, H * stride, W * stride)


if __name__ == "__main__":
    key = jax.random.PRNGKey(0)
    B, C, H, W = 2, 4, 16, 16
    stride = 2
    x = jax.random.normal(key, (B, C, H, W), dtype=jnp.float32)

    out = upsample(x, stride=stride)
    out = jax.block_until_ready(out)

    ref = upsample_ref(x, stride=stride)
    assert out.shape == (B, C, H * stride, W * stride), out.shape
    assert out.dtype == x.dtype
    assert jnp.allclose(out, ref), "mismatch vs reference"

    print("KERNEL_OK")
</pallas_src>

<mosaic_0001>
module attributes {stable_mosaic.version = 11 : i64} {
  func.func @_upsample_kernel(%arg0: i32, %arg1: i32, %arg2: memref<2x16x16xf32, #tpu.memory_space<vmem>>, %arg3: memref<2x16x64xf32, #tpu.memory_space<vmem>>) attributes {dimension_semantics = [#tpu.dimension_semantics<parallel>, #tpu.dimension_semantics<parallel>], iteration_bounds = array<i64: 4, 1>, scalar_prefetch = 0 : i64, scratch_operands = 0 : i64, tpu.core_type = #tpu.core_type<tc>, window_params = [{transform_indices = @transform_0, window_bounds = array<i64: 2, 16, 16>}, {transform_indices = @transform_1, window_bounds = array<i64: 2, 16, 64>}]} {
    %c0 = arith.constant 0 : index
    %c0_0 = arith.constant 0 : index
    %c0_1 = arith.constant 0 : index
    %0 = vector.load %arg2[%c0, %c0_0, %c0_1] : memref<2x16x16xf32, #tpu.memory_space<vmem>>, vector<2x16x16xf32>
    %1 = vector.shape_cast %0 : vector<2x16x16xf32> to vector<2x16x16x1xf32>
    %2 = vector.broadcast %1 : vector<2x16x16x1xf32> to vector<2x16x16x2xf32>
    %3 = vector.shape_cast %2 : vector<2x16x16x2xf32> to vector<2x16x32xf32>
    %4 = tpu.concatenate %3, %3 in 2 : vector<2x16x32xf32>, vector<2x16x32xf32> -> vector<2x16x64xf32>
    %c0_2 = arith.constant 0 : index
    %c0_3 = arith.constant 0 : index
    %c0_4 = arith.constant 0 : index
    %5 = vector.load %arg3[%c0_2, %c0_3, %c0_4] : memref<2x16x64xf32, #tpu.memory_space<vmem>>, vector<2x16x64xf32>
    tpu.vector_store %arg3[%c0_2, %c0_3, %c0_4], %4 {strides = array<i32>} : memref<2x16x64xf32, #tpu.memory_space<vmem>>, vector<2x16x64xf32>,
    return
  }
  func.func @transform_0(%arg0: i32, %arg1: i32) -> (i32, i32, i32) {
    %c0_i32 = arith.constant 0 : i32
    %c0_i32_0 = arith.constant 0 : i32
    return %arg0, %arg1, %c0_i32 : i32, i32, i32
  }
  func.func @transform_1(%arg0: i32, %arg1: i32) -> (i32, i32, i32) {
    %c0_i32 = arith.constant 0 : i32
    %c0_i32_0 = arith.constant 0 : i32
    return %arg0, %arg1, %c0_i32 : i32, i32, i32
  }
}

</mosaic_0001>

<bundles_post_ra>
// kernel: tpu_custom_call.1
= control target key start
LH: loop header
LB: loop body
LE: loop exit
PB: predicated region body
PF: predicated region fallthrough
CT: control target
= control target key end

     0   :  { %6 = vsyncpa [#allocation3], 0  ;;  %s3215_s0 = inlined_call_operand.hbm [shape: f32[8,16,16], index: 0, kind: input, shape index: {}]   ;;  %s3216_s1 = inlined_call_operand.hbm [shape: f32[8,16,64], index: 1, kind: output, shape index: {}]  }
   0x1   :  { %8 = vsyncpa [#allocation3 + $0x1], 0 }
   0x2   :  { %9 = vsyncpa [#allocation4], 0 }
   0x3   :  { %11 = vsyncpa [#allocation4 + $0x1], 0  ;;  %s2202_s6 = smov 0   ;;  %s2204_s7 = smov 0  }
   0x4   :  { %s2206_s8 = smov 0   ;;  %s2208_s9 = smov 0  }
   0x5   :  { %s2210_s10 = smov 0   ;;  %s2212_s11 = smov 0  }
   0x6 LB: > { %s1924_s12 = sadd.s32 4294967295, %s2169_s11   ;;  %s1925_s13 = sadd.s32 4294967294, %s2169_s11   ;;  %s2169_s11 = sphi %s2212_s11, %s17_s11   ;;  %s2165_s10 = sphi %s2210_s10, %s3247_s10   ;;  %s2161_s9 = sphi %s2208_s9, %s3246_s9   ;;  %s2157_s8 = sphi %s2206_s8, %s3245_s8   ;;  %s2153_s7 = sphi %s2204_s7, %s3244_s7   ;;  %s2149_s6 = sphi %s2202_s6, %s3243_s6  }
   0x7   : > { %s29_s14 = sadd.s32 1, %s2165_s10  ;;  %s38_s15 = sadd.s32 1, %s2157_s8 }
   0x8   : > { %p31_p0 = scmp.ge.s32.totalorder %s29_s14, 4  ;;  %p45_p1 = scmp.ne.s32.totalorder %s2157_s8, %s2153_s7 }
   0x9   : > { %p46_p2 = scmp.eq.s32.totalorder %s2169_s11, 0  ;;  %p51_p3 = scmp.ne.s32.totalorder %s2153_s7, %s2149_s6 }
   0xa   : > { %s3249_s14 = smov (%p31_p0, %s29_s14), 0  ;;  %p52_p5 = scmp.eq.s32.totalorder %s1924_s12, 0 }
   0xb   : > { %p2243_p4 = por %p46_p2, %p45_p1  ;;  %s33_s17 = ssub.s32 %s2165_s10, %s3249_s14 }
   0xc   : > { %p77_p6 = scmp.eq.s32.totalorder %s1924_s12, 3  ;;  %p36_p7 = scmp.eq.s32.totalorder %s33_s17, 0 }
   0xd   : > { %p2249_p8 = por %p52_p5, %p51_p3  ;;  %p83_p10 = scmp.eq.s32.totalorder %s1925_s13, 3 }
   0xe   : > { %p2253_p9 = por %p77_p6, %p45_p1  ;;  %p1957_p12 = scmp.lt.s32.totalorder %s2169_s11, 4 }
   0xf   : > { %s2258_s20 = scalar_select %p36_p7, %s2157_s8, %s38_s15  }
  0x10   : > { %p2260_p11 = por %p83_p10, %p51_p3  ;;  %s103_s22 = sand.u32 1, %s2157_s8  }
  0x11   : > { %s1928_s23 = sshll.u32 %s103_s22, 5  ;;  %s1942_s24 = sshll.u32 %s2165_s10, 5 }
  0x12   : > { %s115_s27 = scalar_lea.hbm %s3215_s0, %s1942_s24  ;;  %s107_s28 = scalar_lea.vmem [#allocation2], %s1928_s23 }
  0x13   : > { %s118_s29 = sshll.u32 %s107_s28, 4  ;;  %s116_s30 = sshll.u32 %s115_s27, 4  ;;  %s119_s29 = int_to_ptr.vmem [resolvable:$true] %s118_s29  ;;  %s117_s30 = int_to_ptr.hbm [resolvable:$true] %s116_s30 }
  0x14   : > { %p1950_p13 = pnand %p1957_p12, %p2243_p4  ;;  %p1932_p0 = scmp.ge.s32.totalorder %s2169_s11, 1 }
  0x15   : > { %s104_s2 = scalar_lea.sflag [#allocation3], %s103_s22  ;;  %s2171_s3 = smov 128  }
  0x16   : > { %s2172_s4 = smov 8   ;;  %p126_p1 = scmp.lt.s32.totalorder %s2169_s11, 5 }
  0x17   : > { %1952 = dma.hbm_to_vmem [thread:$0]  (!%p1950_p13), %s117_s30, 512, %s119_s29, %s104_s2, %s2171_s3, %s2171_s3, %s2172_s4  }
  0x18   : > { %p127_p2 = pnand %p1932_p0, %p126_p1 }
  0x1a   : > { %130 = sbr.rel (%p127_p2) target bundleno = 817 (0x331), region = 24 }
  0x1f   : > { %s2275_s5 = sand.u32 1, %s2153_s7  }
  0x20   : > { %s1933_s12 = sshll.u32 %s2275_s5, 5  ;;  %s133_s13 = scalar_lea.sflag [#allocation3], %s2275_s5 }
  0x21   : > { %s2281_s15 = scalar_lea.vmem [#allocation2], %s1933_s12 }
  0x22   : > { %2140 = dma.done.wait (%p2249_p8), %s133_s13, 512  }
  0x23   : > { %2142 = vsyncadd (%p2249_p8), %s133_s13, 4294966784  ;;  %v165_v0 = vlaneseq  ;;  %v160_v2 = vld [vmem:[%s2281_s15] sm:$0xff]  ;;  %v2299_v8 = vld [vmem:[%s2281_s15 + $0x8] sm:$0xff]  ;;  %vm581_vm0 = vcmask 1047556   ;;  %v2173_v43 = vmov 1983009808  }
  0x24   : > { %v190_v3 = vperm.slane %v160_v2, 2  ;;  %v177_v4 = vperm.slane %v160_v2, 1  ;;  %v164_v5 = vperm.slane %v160_v2, 0  ;;  %v216_v7 = vperm.slane %v160_v2, 4  ;;  %v2307_v12 = vld [vmem:[%s2281_s15 + $0x10] sm:$0xff]  ;;  %v2314_v14 = vld [vmem:[%s2281_s15 + $0x18] sm:$0xff] }
  0x25   : > { %v2287_v1 = vshrl.u32 %v165_v0, 7  ;;  %v281_v9 = vperm.slane %v2299_v8, 1  ;;  %v203_v10 = vperm.slane %v160_v2, 3  ;;  %v346_v11 = vperm.slane %v2299_v8, 6  ;;  %s2175_s16 = smov 4   ;;  %s2176_s17 = smov 2  }
  0x26   : > { %v411_v13 = vperm.slane %v2307_v12, 3  ;;  %v229_v15 = vperm.slane %v160_v2, 5  ;;  %v476_v16 = vperm.slane %v2314_v14, 0  ;;  %v242_v17 = vperm.slane %v160_v2, 6  ;;  %s2177_s18 = smov 6   ;;  %s2178_s22 = smov 8  }
  0x27   : > { %2030 = vset.pattern.permute.xlu2 %v2287_v1  ;;  %2029 = vset.pattern.permute.xlu1 %v2287_v1  ;;  %v2294_v6 = vadd.s32 8, %v2287_v1  ;;  %v541_v18 = vperm.slane %v2314_v14, 5  ;;  %v255_v19 = vperm.slane %v160_v2, 7  ;;  %v268_v20 = vperm.slane %v2299_v8, 0  ;;  %s2179_s23 = smov 10   ;;  %s2180_s24 = smov 12  }
  0x28   : > { %2028 = vset.pattern.permute.xlu0 %v2287_v1  ;;  %v307_v21 = vperm.slane %v2299_v8, 3  ;;  %v294_v22 = vperm.slane %v2299_v8, 2  ;;  %v320_v24 = vperm.slane %v2299_v8, 4  ;;  %v372_v25 = vperm.slane %v2307_v12, 0  ;;  %s2181_s25 = smov 14   ;;  %s2182_s26 = smov 16  }
  0x29   : > { %v333_v29 = vperm.slane %v2299_v8, 5  ;;  %v359_v40 = vperm.slane %v2299_v8, 7  ;;  %v586_v44 = vunpack.c.l.s4 %v2173_v43  ;;  %v437_v48 = vperm.slane %v2307_v12, 5  ;;  %s2183_s27 = smov 18   ;;  %s2184_s28 = smov 20  }
  0x2a   : > { %v502_v61 = vperm.slane %v2314_v14, 2  ;;  %v567_v8 = vperm.slane %v2314_v14, 7  ;;  %vm1717_vm1 = vcmask 15360   ;;  %vm1722_vm2 = vcmask 31744   ;;  %s2185_s29 = smov 22   ;;  %s2186_s30 = smov 24  }
  0x2b   : > { %v2357_v49 = vunpack.c.0.s8 %v586_v44  ;;  %vm1727_vm3 = vcmask 48128   ;;  %s2187_s2 = smov 26   ;;  %vm1732_vm4 = vcmask 64512   ;;  %s2188_s3 = smov 28   ;;  %vm1737_vm5 = vcmask 80896  }
  0x2c   : > { %s2189_s4 = smov 30   ;;  %vm1742_vm6 = vcmask 97280   ;;  %vm1747_vm7 = vcmask 113664   ;;  %vm1752_vm8 = vcmask 130048   ;;  %vm1757_vm9 = vcmask 146432   ;;  %s2190_s13 = smov 32  }
  0x2d   : > { %vm1762_vm10 = vcmask 162816   ;;  %vm1772_vm11 = vcmask 195584   ;;  %vm1767_vm12 = vcmask 179200   ;;  %vm1777_vm13 = vcmask 211968   ;;  %s155_s15 = scalar_lea.vmem [#allocation5], %s1933_s12 }
  0x2e   : > { %vm1787_vm14 = vcmask 244736   ;;  %vm1782_vm15 = vcmask 228352   ;;  %s1834_s12 = sshll.u32 %s155_s15, 4  ;;  %s1835_s12 = int_to_ptr.vmem [resolvable:$true] %s1834_s12 }
  0x2f   : > { %195 = vperm.xlu2 %2030, %v190_v3   ;;  %182 = vperm.xlu1 %2029, %v177_v4  }
  0x30   : > { %169 = vperm.xlu0 %2028, %v164_v5  }
  0x37   : > { %2033 = vset.pattern.permute.xlu2 %v2294_v6  ;;  %2031 = vset.pattern.permute.xlu1 %v2294_v6 }
  0x38   : > { %221 = vperm.xlu0 %2028, %v216_v7  }
  0x3f   : > { %201 = vperm.xlu2 %2033, %v190_v3   ;;  %188 = vperm.xlu1 %2031, %v177_v4  }
  0x40   : > { %286 = vperm.xlu0 %2028, %v281_v9  }
  0x47   : > { %214 = vperm.xlu2 %2033, %v203_v10   ;;  %2032 = vset.pattern.permute.xlu1 %v2287_v1 }
  0x48   : > { %351 = vperm.xlu0 %2028, %v346_v11  }
  0x4f   : > { %2035 = vset.pattern.permute.xlu2 %v2287_v1  ;;  %208 = vperm.xlu1 %2032, %v203_v10  }
  0x50   : > { %416 = vperm.xlu0 %2028, %v411_v13  }
  0x57   : > { %234 = vperm.xlu2 %2035, %v229_v15   ;;  %2034 = vset.pattern.permute.xlu1 %v2294_v6 }
  0x58   : > { %481 = vperm.xlu0 %2028, %v476_v16  }
  0x5f   : > { %247 = vperm.xlu2 %2035, %v242_v17   ;;  %227 = vperm.xlu1 %2034, %v216_v7   ;;  %v385_v7 = vperm.slane %v2307_v12, 1 }
  0x60   : > { %546 = vperm.xlu0 %2028, %v541_v18  }
  0x67   : > { %2037 = vset.pattern.permute.xlu2 %v2294_v6  ;;  %240 = vperm.xlu1 %2034, %v229_v15   ;;  %v398_v15 = vperm.slane %v2307_v12, 2 }
  0x68   : > { %2054 = vset.pattern.permute.xlu0 %v2294_v6 }
  0x6f   : > { %266 = vperm.xlu2 %2037, %v255_v19   ;;  %2036 = vset.pattern.permute.xlu1 %v2287_v1 }
  0x70   : > { %175 = vperm.xlu0 %2054, %v164_v5  }
  0x77   : > { %279 = vperm.xlu2 %2037, %v268_v20   ;;  %260 = vperm.xlu1 %2036, %v255_v19  }
  0x78   : > { %253 = vperm.xlu0 %2054, %v242_v17  }
  0x7f   : > { %2039 = vset.pattern.permute.xlu2 %v2287_v1  ;;  %273 = vperm.xlu1 %2036, %v268_v20  }
  0x80   : > { %318 = vperm.xlu0 %2054, %v307_v21  }
  0x87   : > { %299 = vperm.xlu2 %2039, %v294_v22   ;;  %2038 = vset.pattern.permute.xlu1 %v2294_v6 }
  0x88   : > { %383 = vperm.xlu0 %2054, %v372_v25  }
  0x89   : > { %v196_v23 = vpop.permute.xlu2 %195 }
  0x8a   : > { %v580_v53 = vrot.slane %v196_v23, 4 }
  0x8f   : > { %312 = vperm.xlu2 %2039, %v307_v21   ;;  %292 = vperm.xlu1 %2038, %v281_v9  }
  0x90   : > { %448 = vperm.xlu0 %2054, %v437_v48  }
  0x97   : > { %2041 = vset.pattern.permute.xlu2 %v2294_v6  ;;  %305 = vperm.xlu1 %2038, %v294_v22  }
  0x98   : > { %513 = vperm.xlu0 %2054, %v502_v61  }
  0x99   : > { %v2334_v26 = vpop.permute.xlu2 %201 }
  0x9a   : > { %v805_v44 = vrot.slane %v2334_v26, 4 }
  0x9f   : > { %331 = vperm.xlu2 %2041, %v320_v24   ;;  %2040 = vset.pattern.permute.xlu1 %v2287_v1 }
  0xa0   : > { %578 = vperm.xlu0 %2054, %v567_v8  }
  0xa1   : > { %v215_v31 = vpop.permute.xlu2 %214  ;;  %v183_v32 = vpop.permute.xlu1 %182 }
  0xa2   : > { %v170_v27 = vpop.permute.xlu0 %169  ;;  %v817_v34 = vrot.slane %v215_v31, 4  ;;  %v595_v51 = vrot.slane %v183_v32, 4 }
  0xa3   : > { %v583_v28 = vrot.slane %v170_v27, 4  ;;  %v582_v58 = vsel %vm581_vm0, %v580_v53, %v170_v27  ;;  %v2174_v27 = vmov 1934713408  }
  0xa4   : > { %v588_v2 = vperm.slane %v582_v58, %v2357_v49 }
  0xa5   : > { %v584_v30 = vsel %vm581_vm0, %v196_v23, %v583_v28  ;;  %v634_v28 = vunpack.c.l.s4 %v2174_v27 }
  0xa6   : > { %v592_v50 = vperm.slane %v584_v30, %v2357_v49 }
  0xa7   : > { %344 = vperm.xlu2 %2041, %v333_v29   ;;  %325 = vperm.xlu1 %2040, %v320_v24  }
  0xa8   : > { %v643_v56 = vrot.slane %v592_v50, 4 }
  0xaa   : > { %v2339_v33 = vpop.permute.xlu0 %221 }
  0xab   : > { %v607_v42 = vrot.slane %v2339_v33, 4 }
  0xaf   : > { %2043 = vset.pattern.permute.xlu2 %v2287_v1  ;;  %338 = vperm.xlu1 %2040, %v333_v29  }
  0xb1   : > { %v2342_v35 = vpop.permute.xlu2 %234  ;;  %v189_v36 = vpop.permute.xlu1 %188 }
  0xb2   : > { %v2345_v37 = vsel %vm581_vm0, %v817_v34, %v189_v36  ;;  %v819_v38 = vrot.slane %v189_v36, 4  ;;  %v2347_v39 = vpop.permute.xlu0 %286 }
  0xb3   : > { %v2407_v34 = vperm.slane %v2345_v37, %v2357_v49  ;;  %v707_v37 = vrot.slane %v2347_v39, 4 }
  0xb4   : > { %v820_v41 = vsel %vm581_vm0, %v215_v31, %v819_v38  ;;  %v424_v38 = vperm.slane %v2307_v12, 4 }
  0xb5   : > { %v2403_v31 = vperm.slane %v820_v41, %v2357_v49  ;;  %v853_v53 = vrot.slane %v2407_v34, 4 }
  0xb7   : > { %364 = vperm.xlu2 %2043, %v359_v40   ;;  %2042 = vset.pattern.permute.xlu1 %v2294_v6 }
  0xb9   : > { %v248_v45 = vpop.permute.xlu2 %247 }
  0xba   : > { %v608_v46 = vsel %vm581_vm0, %v248_v45, %v607_v42  ;;  %v2354_v47 = vpop.permute.xlu0 %351  ;;  %v631_v42 = vrot.slane %v588_v2, 4 }
  0xbf   : > { %377 = vperm.xlu2 %2043, %v372_v25   ;;  %357 = vperm.xlu1 %2042, %v346_v11   ;;  %v605_v25 = vrot.slane %v248_v45, 4  ;;  %v865_v45 = vrot.slane %v2403_v31, 4 }
  0xc1   : > { %v209_v52 = vpop.permute.xlu1 %208  ;;  %v606_v29 = vsel %vm581_vm0, %v605_v25, %v2339_v33  ;;  %v616_v33 = vperm.slane %v608_v46, %v2357_v49 }
  0xc2   : > { %v593_v54 = vrot.slane %v209_v52, 4  ;;  %v596_v55 = vsel %vm581_vm0, %v209_v52, %v595_v51  ;;  %v2368_v60 = vpop.permute.xlu0 %416  ;;  %v612_v43 = vperm.slane %v606_v29, %v2357_v49  ;;  %v619_v52 = vrot.slane %v2342_v35, 4 }
  0xc3   : > { %v604_v57 = vperm.slane %v596_v55, %v2357_v49  ;;  %v667_v55 = vrot.slane %v616_v33, 4 }
  0xc4   : > { %v594_v59 = vsel %vm581_vm0, %v593_v54, %v183_v32  ;;  %v655_v54 = vrot.slane %v612_v43, 4 }
  0xc5   : > { %v600_v62 = vperm.slane %v594_v59, %v2357_v49  ;;  %v641_v63 = vrot.slane %v604_v57, 4  ;;  %v644_v0 = vsel %vm581_vm0, %v604_v57, %v643_v56 }
  0xc7   : > { %v629_v3 = vrot.slane %v600_v62, 4  ;;  %2045 = vset.pattern.permute.xlu2 %v2294_v6  ;;  %370 = vperm.xlu1 %2042, %v359_v40   ;;  %v642_v4 = vsel %vm581_vm0, %v641_v63, %v592_v50  ;;  %v2410_v40 = vunpack.c.0.s8 %v634_v28  ;;  %v632_v51 = vsel %vm581_vm0, %v600_v62, %v631_v42 }
  0xc9   : > { %v2379_v5 = vsel %vm581_vm0, %v629_v3, %v588_v2  ;;  %v267_v10 = vpop.permute.xlu2 %266  ;;  %v2447_v2 = vperm.slane %v642_v4, %v2410_v40 }
  0xca   : > { %v2383_v9 = vpop.permute.xlu0 %481  ;;  %v841_v17 = vrot.slane %v267_v10, 4  ;;  %v636_v28 = vperm.slane %v2379_v5, %v2410_v40 }
  0xcf   : > { %396 = vperm.xlu2 %2045, %v385_v7   ;;  %2044 = vset.pattern.permute.xlu1 %v2287_v1 }
  0xd1   : > { %v2388_v11 = vpop.permute.xlu1 %227  ;;  %v2393_v20 = vpop.permute.xlu2 %279 }
  0xd2   : > { %v2391_v19 = vpop.permute.xlu0 %546  ;;  %v831_v58 = vrot.slane %v2388_v11, 4 }
  0xd7   : > { %409 = vperm.xlu2 %2045, %v398_v15   ;;  %390 = vperm.xlu1 %2044, %v385_v7  }
  0xd9   : > { %v241_v21 = vpop.permute.xlu1 %240 }
  0xda   : > { %v842_v22 = vsel %vm581_vm0, %v841_v17, %v241_v21  ;;  %v843_v23 = vrot.slane %v241_v21, 4 }
  0xdb   : > { %v2441_v59 = vperm.slane %v842_v22, %v2357_v49 }
  0xdc   : > { %v844_v24 = vsel %vm581_vm0, %v267_v10, %v843_v23 }
  0xdd   : > { %v2433_v56 = vperm.slane %v844_v24, %v2357_v49  ;;  %v877_v29 = vrot.slane %v2441_v59, 4 }
  0xdf   : > { %2047 = vset.pattern.permute.xlu2 %v2287_v1  ;;  %403 = vperm.xlu1 %2044, %v398_v15   ;;  %v889_v25 = vrot.slane %v2433_v56, 4 }
  0xe1   : > { %v2400_v30 = vpop.permute.xlu2 %299 }
  0xe2   : > { %v176_v32 = vpop.permute.xlu0 %175 }
  0xe3   : > { %v807_v36 = vrot.slane %v176_v32, 4  ;;  %v806_v46 = vsel %vm581_vm0, %v805_v44, %v176_v32 }
  0xe4   : > { %v812_v3 = vperm.slane %v806_v46, %v2357_v49 }
  0xe5   : > { %v808_v41 = vsel %vm581_vm0, %v2334_v26, %v807_v36  ;;  %v2430_v26 = vperm.slane %v644_v0, %v2410_v40  ;;  %v640_v0 = vperm.slane %v632_v51, %v2410_v40 }
  0xe6   : > { %v2420_v50 = vperm.slane %v808_v41, %v2357_v49  ;;  %v854_v44 = vsel %vm581_vm0, %v853_v53, %v812_v3 }
  0xe7   : > { %429 = vperm.xlu2 %2047, %v424_v38   ;;  %2046 = vset.pattern.permute.xlu1 %v2294_v6  ;;  %v691_v24 = vrot.slane %v2430_v26, 4  ;;  %v683_v42 = vrot.slane %v640_v0, 4 }
  0xe8   : > { %v2437_v57 = vsel %vm581_vm0, %v865_v45, %v2420_v50 }
  0xe9   : > { %v2443_v62 = vpop.permute.xlu2 %312  ;;  %v261_v63 = vpop.permute.xlu1 %260 }
  0xea   : > { %v708_v7 = vsel %vm581_vm0, %v2443_v62, %v707_v37  ;;  %v617_v10 = vrot.slane %v261_v63, 4  ;;  %v620_v15 = vsel %vm581_vm0, %v261_v63, %v619_v52  ;;  %v254_v17 = vpop.permute.xlu0 %253  ;;  %v855_v37 = vrot.slane %v812_v3, 4 }
  0xeb   : > { %v628_v21 = vperm.slane %v620_v15, %v2357_v49  ;;  %v829_v22 = vrot.slane %v254_v17, 4  ;;  %v832_v23 = vsel %vm581_vm0, %v254_v17, %v831_v58  ;;  %v716_v58 = vperm.slane %v708_v7, %v2357_v49 }
  0xec   : > { %v618_v4 = vsel %vm581_vm0, %v617_v10, %v2342_v35  ;;  %v2460_v27 = vperm.slane %v832_v23, %v2357_v49  ;;  %v679_v15 = vrot.slane %v636_v28, 4  ;;  %v867_v17 = vrot.slane %v2420_v50, 4 }
  0xed   : > { %v624_v32 = vperm.slane %v618_v4, %v2357_v49  ;;  %v665_v36 = vrot.slane %v628_v21, 4  ;;  %v668_v41 = vsel %vm581_vm0, %v628_v21, %v667_v55  ;;  %v830_v45 = vsel %vm581_vm0, %v829_v22, %v2388_v11 }
  0xee   : > { %v890_v35 = vsel %vm581_vm0, %v889_v25, %v2460_v27  ;;  %v836_v5 = vperm.slane %v830_v45, %v2357_v49  ;;  %v676_v11 = vperm.slane %v668_v41, %v2410_v40  ;;  %v687_v55 = vrot.slane %v2447_v2, 4 }
  0xef   : > { %v653_v51 = vrot.slane %v624_v32, 4  ;;  %442 = vperm.xlu2 %2047, %v437_v48   ;;  %422 = vperm.xlu1 %2046, %v411_v13   ;;  %v656_v52 = vsel %vm581_vm0, %v624_v32, %v655_v54  ;;  %v666_v46 = vsel %vm581_vm0, %v665_v36, %v616_v33  ;;  %v860_v33 = vperm.slane %v854_v44, %v2410_v40 }
  0xf0   : > { %v664_v53 = vperm.slane %v656_v52, %v2410_v40  ;;  %v672_v48 = vperm.slane %v666_v46, %v2410_v40  ;;  %v878_v13 = vsel %vm581_vm0, %v877_v29, %v836_v5  ;;  %v689_v4 = vrot.slane %v676_v11, 4 }
  0xf1   : > { %v2483_v63 = vpop.permute.xlu1 %273  ;;  %v654_v3 = vsel %vm581_vm0, %v653_v51, %v612_v43  ;;  %v856_v43 = vsel %vm581_vm0, %v2407_v34, %v855_v37  ;;  %v753_v29 = vrot.slane %v716_v58, 4  ;;  %v879_v32 = vrot.slane %v836_v5, 4 }
  0xf2   : > { %v695_v54 = vrot.slane %v2483_v63, 4  ;;  %v681_v10 = vrot.slane %v664_v53, 4  ;;  %v660_v21 = vperm.slane %v654_v3, %v2410_v40  ;;  %v2493_v7 = vsel %vm581_vm0, %v664_v53, %v683_v42 }
  0xf3   : > { %v685_v25 = vrot.slane %v672_v48, 4  ;;  %v864_v44 = vperm.slane %v856_v43, %v2410_v40  ;;  %v2521_v37 = vsel %vm581_vm0, %v672_v48, %v687_v55  ;;  %v891_v51 = vrot.slane %v2460_v27, 4 }
  0xf4   : > { %v696_v22 = vsel %vm581_vm0, %v2400_v30, %v695_v54  ;;  %v682_v23 = vsel %vm581_vm0, %v681_v10, %v640_v0  ;;  %v2503_v50 = vsel %vm581_vm0, %v660_v21, %v679_v15  ;;  %v677_v42 = vrot.slane %v660_v21, 4 }
  0xf5   : > { %v704_v36 = vperm.slane %v696_v22, %v2357_v49  ;;  %1497 = vrot.lane.b32.xlu0 %v682_v23, %s2175_s16  ;;  %v2507_v34 = vsel %vm581_vm0, %v685_v25, %v2447_v2  ;;  %v2511_v0 = vsel %vm581_vm0, %v689_v4, %v2430_v26  ;;  %v896_v2 = vperm.slane %v890_v35, %v2410_v40 }
  0xf6   : > { %v2526_v26 = vsel %vm581_vm0, %v677_v42, %v636_v28  ;;  %v903_v5 = vrot.slane %v860_v33, 4  ;;  %v872_v52 = vperm.slane %v2437_v57, %v2410_v40  ;;  %v884_v46 = vperm.slane %v878_v13, %v2410_v40 }
  0xf7   : > { %v755_v41 = vrot.slane %v704_v36, 4  ;;  %2049 = vset.pattern.permute.xlu2 %v2294_v6  ;;  %435 = vperm.xlu1 %2046, %v424_v38   ;;  %v2518_v45 = vsel %vm581_vm0, %v753_v29, %v704_v36  ;;  %v2534_v38 = vsel %vm581_vm0, %v676_v11, %v691_v24  ;;  %v880_v35 = vsel %vm581_vm0, %v2441_v59, %v879_v32 }
  0xf8   : > { %v450_v27 = vperm.slane %v2307_v12, 6  ;;  %v907_v55 = vrot.slane %v864_v44, 4  ;;  %v2541_v28 = vsel %vm581_vm0, %v884_v46, %v903_v5  ;;  %v901_v3 = vrot.slane %v884_v46, 4 }
  0xf9   : > { %v2531_v53 = vsel %vm581_vm0, %v716_v58, %v755_v41  ;;  %v888_v57 = vperm.slane %v880_v35, %v2410_v40  ;;  %v909_v48 = vrot.slane %v896_v2, 4  ;;  %v911_v58 = vrot.slane %v872_v52, 4  ;;  %v2574_v42 = vpop.permute.xlu2 %331 }
  0xfa   : > { %v868_v24 = vsel %vm581_vm0, %v2403_v31, %v867_v17  ;;  %v892_v11 = vsel %vm581_vm0, %v2433_v56, %v891_v51  ;;  %v2549_v13 = vsel %vm581_vm0, %v901_v3, %v860_v33  ;;  %v319_v56 = vpop.permute.xlu0 %318  ;;  %v463_v29 = vperm.slane %v2307_v12, 7 }
  0xfb   : > { %v905_v59 = vrot.slane %v888_v57, 4  ;;  %v2552_v54 = vsel %vm581_vm0, %v909_v48, %v872_v52  ;;  %v2555_v10 = vsel %vm581_vm0, %v888_v57, %v907_v55  ;;  %v2558_v15 = vsel %vm581_vm0, %v896_v2, %v911_v58 }
  0xfc   : > { %3221 = vst [vmem:[#allocation8_spill] sm:$0xff] %v2558_v15  ;;  %v876_v21 = vperm.slane %v868_v24, %v2410_v40  ;;  %v900_v31 = vperm.slane %v892_v11, %v2410_v40  ;;  %v929_v23 = vrot.slane %v319_v56, 4  ;;  %v919_v2 = vrot.slane %v2393_v20, 4 }
  0xfd   : > { %v2564_v33 = vsel %vm581_vm0, %v905_v59, %v864_v44 }
  0xfe   : > { %v915_v17 = vrot.slane %v876_v21, 4  ;;  %v913_v43 = vrot.slane %v900_v31, 4 }
  0xff   : > { %461 = vperm.xlu2 %2049, %v450_v27   ;;  %2048 = vset.pattern.permute.xlu1 %v2287_v1 }
 0x100   : > { %v2567_v4 = vsel %vm581_vm0, %v900_v31, %v915_v17  ;;  %v2571_v32 = vsel %vm581_vm0, %v913_v43, %v876_v21  ;;  %v489_v21 = vperm.slane %v2314_v14, 1 }
 0x101   : > { %v293_v22 = vpop.permute.xlu1 %292  ;;  %3222 = vst [vmem:[#allocation9_spill] sm:$0xff] %v2567_v4  ;;  %v2588_v58 = vpop.permute.xlu2 %344 }
 0x102   : > { %v931_v25 = vrot.slane %v293_v22, 4  ;;  %3223 = vst [vmem:[#allocation10_spill] sm:$0xff] %v2571_v32  ;;  %v930_v44 = vsel %vm581_vm0, %v929_v23, %v293_v22  ;;  %v717_v23 = vrot.slane %v2354_v47, 4 }
 0x103   : > { %v936_v51 = vperm.slane %v930_v44, %v2357_v49 }
 0x104   : > { %v932_v36 = vsel %vm581_vm0, %v319_v56, %v931_v25  ;;  %v705_v56 = vrot.slane %v2443_v62, 4  ;;  %v693_v25 = vrot.slane %v2400_v30, 4 }
 0x105   : > { %v940_v41 = vperm.slane %v932_v36, %v2357_v49  ;;  %v965_v3 = vrot.slane %v936_v51, 4 }
 0x106   : > { %v706_v22 = vsel %vm581_vm0, %v705_v56, %v2347_v39  ;;  %v694_v36 = vsel %vm581_vm0, %v693_v25, %v2483_v63  ;;  %v515_v25 = vperm.slane %v2314_v14, 3 }
 0x107   : > { %474 = vperm.xlu2 %2049, %v463_v29   ;;  %455 = vperm.xlu1 %2048, %v450_v27   ;;  %v977_v46 = vrot.slane %v940_v41, 4  ;;  %v2614_v62 = vperm.slane %v706_v22, %v2357_v49 }
 0x109   : > { %v306_v5 = vpop.permute.xlu1 %305 }
 0x10a   : > { %v917_v52 = vrot.slane %v306_v5, 4  ;;  %v920_v12 = vsel %vm581_vm0, %v306_v5, %v919_v2  ;;  %v741_v5 = vrot.slane %v2614_v62, 4 }
 0x10b   : > { %v928_v35 = vperm.slane %v920_v12, %v2357_v49 }
 0x10c   : > { %v918_v55 = vsel %vm581_vm0, %v917_v52, %v2393_v20  ;;  %v764_v52 = vperm.slane %v2531_v53, %v2410_v40 }
 0x10d   : > { %v924_v57 = vperm.slane %v918_v55, %v2357_v49  ;;  %v979_v48 = vrot.slane %v928_v35, 4  ;;  %v2586_v27 = vsel %vm581_vm0, %v977_v46, %v928_v35 }
 0x10f   : > { %v967_v24 = vrot.slane %v924_v57, 4  ;;  %2051 = vset.pattern.permute.xlu2 %v2287_v1  ;;  %468 = vperm.xlu1 %2048, %v463_v29   ;;  %v2592_v11 = vsel %vm581_vm0, %v965_v3, %v924_v57  ;;  %v2595_v59 = vsel %vm581_vm0, %v940_v41, %v979_v48  ;;  %v760_v3 = vperm.slane %v2518_v45, %v2410_v40 }
 0x111   : > { %v2598_v20 = vsel %vm581_vm0, %v936_v51, %v967_v24  ;;  %v365_v31 = vpop.permute.xlu2 %364  ;;  %v2624_v51 = vperm.slane %v694_v36, %v2357_v49 }
 0x112   : > { %v729_v39 = vrot.slane %v365_v31, 4 }
 0x113   : > { %v742_v57 = vsel %vm581_vm0, %v741_v5, %v2624_v51 }
 0x114   : > { %v2654_v22 = vperm.slane %v742_v57, %v2410_v40 }
 0x117   : > { %494 = vperm.xlu2 %2051, %v489_v21   ;;  %2050 = vset.pattern.permute.xlu1 %v2294_v6 }
 0x119   : > { %v326_v17 = vpop.permute.xlu1 %325  ;;  %v2618_v44 = vpop.permute.xlu2 %377 }
 0x11a   : > { %v719_v43 = vrot.slane %v326_v17, 4 }
 0x11c   : > { %v720_v29 = vsel %vm581_vm0, %v2354_v47, %v719_v43  ;;  %v718_v47 = vsel %vm581_vm0, %v717_v23, %v326_v17  ;;  %v803_v43 = vrot.slane %v764_v52, 4  ;;  %v799_v23 = vrot.slane %v760_v3, 4 }
 0x11d   : > { %v728_v30 = vperm.slane %v720_v29, %v2357_v49  ;;  %v2634_v12 = vperm.slane %v718_v47, %v2357_v49  ;;  %v2658_v29 = vpop.permute.xlu0 %383 }
 0x11e   : > { %v1255_v5 = vrot.slane %v2658_v29, 4 }
 0x11f   : > { %507 = vperm.xlu2 %2051, %v502_v61   ;;  %487 = vperm.xlu1 %2050, %v476_v16   ;;  %v779_v46 = vrot.slane %v728_v30, 4 }
 0x121   : > { %v339_v41 = vpop.permute.xlu1 %338 }
 0x122   : > { %v730_v2 = vsel %vm581_vm0, %v729_v39, %v339_v41  ;;  %v731_v61 = vrot.slane %v339_v41, 4 }
 0x123   : > { %v2627_v16 = vperm.slane %v730_v2, %v2357_v49 }
 0x124   : > { %v732_v63 = vsel %vm581_vm0, %v365_v31, %v731_v61 }
 0x125   : > { %v740_v35 = vperm.slane %v732_v63, %v2357_v49  ;;  %v765_v55 = vrot.slane %v2627_v16, 4 }
 0x127   : > { %v777_v48 = vrot.slane %v740_v35, 4  ;;  %2053 = vset.pattern.permute.xlu2 %v2294_v6  ;;  %500 = vperm.xlu1 %2050, %v489_v21   ;;  %v766_v53 = vsel %vm581_vm0, %v765_v55, %v2634_v12  ;;  %v780_v24 = vsel %vm581_vm0, %v740_v35, %v779_v46  ;;  %v943_v46 = vrot.slane %v2574_v42, 4 }
 0x128   : > { %v2647_v31 = vperm.slane %v766_v53, %v2410_v40  ;;  %v788_v56 = vperm.slane %v780_v24, %v2410_v40  ;;  %v528_v53 = vperm.slane %v2314_v14, 4 }
 0x129   : > { %v2650_v17 = vpop.permute.xlu2 %396  ;;  %v778_v45 = vsel %vm581_vm0, %v777_v48, %v728_v30 }
 0x12a   : > { %v789_v21 = vrot.slane %v2647_v31, 4  ;;  %v784_v36 = vperm.slane %v778_v45, %v2410_v40  ;;  %v801_v39 = vrot.slane %v788_v56, 4  ;;  %v2662_v41 = vsel %vm581_vm0, %v788_v56, %v803_v43 }
 0x12b   : > { %v955_v56 = vrot.slane %v2588_v58, 4 }
 0x12c   : > { %v2666_v30 = vsel %vm581_vm0, %v789_v21, %v2654_v22  ;;  %v2669_v47 = vsel %vm581_vm0, %v784_v36, %v799_v23  ;;  %v797_v2 = vrot.slane %v784_v36, 4  ;;  %v2672_v61 = vsel %vm581_vm0, %v801_v39, %v764_v52 }
 0x12d   : > { %v988_v36 = vperm.slane %v2595_v59, %v2410_v40  ;;  %v972_v59 = vperm.slane %v2592_v11, %v2410_v40 }
 0x12e   : > { %v2677_v63 = vsel %vm581_vm0, %v797_v2, %v760_v3 }
 0x12f   : > { %526 = vperm.xlu2 %2053, %v515_v25   ;;  %2052 = vset.pattern.permute.xlu1 %v2287_v1 }
 0x131   : > { %v2680_v35 = vpop.permute.xlu2 %409  ;;  %v358_v55 = vpop.permute.xlu1 %357 }
 0x132   : > { %v2684_v57 = vsel %vm581_vm0, %v2680_v35, %v1255_v5  ;;  %v941_v48 = vrot.slane %v358_v55, 4  ;;  %v944_v52 = vsel %vm581_vm0, %v358_v55, %v943_v46  ;;  %v984_v5 = vperm.slane %v2586_v27, %v2410_v40 }
 0x133   : > { %v952_v3 = vperm.slane %v944_v52, %v2357_v49 }
 0x134   : > { %v942_v24 = vsel %vm581_vm0, %v941_v48, %v2574_v42  ;;  %v976_v42 = vperm.slane %v2598_v20, %v2410_v40 }
 0x135   : > { %v948_v45 = vperm.slane %v942_v24, %v2357_v49  ;;  %v1003_v39 = vrot.slane %v952_v3, 4 }
 0x136   : > { %v1019_v20 = vrot.slane %v976_v42, 4 }
 0x137   : > { %539 = vperm.xlu2 %2053, %v528_v53   ;;  %520 = vperm.xlu1 %2052, %v515_v25   ;;  %v991_v46 = vrot.slane %v948_v45, 4 }
 0x139   : > { %v371_v43 = vpop.permute.xlu1 %370 }
 0x13a   : > { %v953_v21 = vrot.slane %v371_v43, 4  ;;  %v956_v23 = vsel %vm581_vm0, %v371_v43, %v955_v56  ;;  %v1027_v56 = vrot.slane %v988_v36, 4 }
 0x13b   : > { %v964_v2 = vperm.slane %v956_v23, %v2357_v49 }
 0x13c   : > { %v954_v25 = vsel %vm581_vm0, %v953_v21, %v2588_v58 }
 0x13d   : > { %v960_v55 = vperm.slane %v954_v25, %v2357_v49  ;;  %v1001_v48 = vrot.slane %v964_v2, 4  ;;  %v1004_v52 = vsel %vm581_vm0, %v964_v2, %v1003_v39  ;;  %v1023_v25 = vrot.slane %v984_v5, 4 }
 0x13e   : > { %v1012_v24 = vperm.slane %v1004_v52, %v2410_v40 }
 0x13f   : > { %v989_v43 = vrot.slane %v960_v55, 4  ;;  %2056 = vset.pattern.permute.xlu2 %v2287_v1  ;;  %533 = vperm.xlu1 %2052, %v528_v53   ;;  %v992_v58 = vsel %vm581_vm0, %v960_v55, %v991_v46  ;;  %v1002_v27 = vsel %vm581_vm0, %v1001_v48, %v952_v3  ;;  %v1015_v1 = vrot.slane %v972_v59, 4 }
 0x140   : > { %v1000_v21 = vperm.slane %v992_v58, %v2410_v40  ;;  %v1008_v23 = vperm.slane %v1002_v27, %v2410_v40  ;;  %v1025_v39 = vrot.slane %v1012_v24, 4  ;;  %v2714_v2 = vsel %vm581_vm0, %v1012_v24, %v1027_v56 }
 0x141   : > { %3224 = vst [vmem:[#allocation11_spill] sm:$0xff] %v2714_v2  ;;  %v990_v11 = vsel %vm581_vm0, %v989_v43, %v948_v45  ;;  %v554_v3 = vperm.slane %v2314_v14, 6  ;;  %v2740_v27 = vpop.permute.xlu2 %429 }
 0x142   : > { %v996_v52 = vperm.slane %v990_v11, %v2410_v40  ;;  %v2719_v53 = vsel %vm581_vm0, %v1000_v21, %v1019_v20  ;;  %v1017_v46 = vrot.slane %v1000_v21, 4  ;;  %v1021_v55 = vrot.slane %v1008_v23, 4 }
 0x143   : > { %v2723_v48 = vsel %vm581_vm0, %v1025_v39, %v988_v36  ;;  %v2726_v58 = vsel %vm581_vm0, %v1008_v23, %v1023_v25 }
 0x144   : > { %3225 = vst [vmem:[#allocation12_spill] sm:$0xff] %v2723_v48  ;;  %v1013_v24 = vrot.slane %v996_v52, 4  ;;  %v2729_v45 = vsel %vm581_vm0, %v996_v52, %v1015_v1  ;;  %v2732_v56 = vsel %vm581_vm0, %v1017_v46, %v976_v42  ;;  %v2735_v43 = vsel %vm581_vm0, %v1021_v55, %v984_v5 }
 0x145   : > { %3226 = vst [vmem:[#allocation13_spill] sm:$0xff] %v2726_v58  ;;  %v1031_v5 = vrot.slane %v2618_v44, 4  ;;  %v791_v52 = vrot.slane %v2654_v22, 4  ;;  %v1253_v55 = vrot.slane %v2680_v35, 4 }
 0x146   : > { %3227 = vst [vmem:[#allocation14_spill] sm:$0xff] %v2735_v43  ;;  %v2738_v20 = vsel %vm581_vm0, %v1013_v24, %v972_v59  ;;  %v1267_v24 = vrot.slane %v2650_v17, 4 }
 0x147   : > { %559 = vperm.xlu2 %2056, %v554_v3   ;;  %2055 = vset.pattern.permute.xlu1 %v2294_v6  ;;  %v792_v14 = vsel %vm581_vm0, %v2647_v31, %v791_v52  ;;  %v1254_v22 = vsel %vm581_vm0, %v1253_v55, %v2658_v29  ;;  %v1264_v31 = vperm.slane %v2684_v57, %v2357_v49 }
 0x149   : > { %v2743_v36 = vpop.permute.xlu1 %390  ;;  %v2754_v59 = vpop.permute.xlu2 %442 }
 0x14a   : > { %v1043_v21 = vrot.slane %v2743_v36, 4 }
 0x14c   : > { %v1044_v23 = vsel %vm581_vm0, %v2368_v60, %v1043_v21  ;;  %v1260_v21 = vperm.slane %v1254_v22, %v2357_v49 }
 0x14d   : > { %v1052_v42 = vperm.slane %v1044_v23, %v2357_v49 }
 0x14f   : > { %572 = vperm.xlu2 %2056, %v567_v8   ;;  %552 = vperm.xlu1 %2055, %v541_v18   ;;  %v1089_v11 = vrot.slane %v1052_v42, 4 }
 0x151   : > { %v2756_v6 = vpop.permute.xlu1 %403 }
 0x152   : > { %v1032_v39 = vsel %vm581_vm0, %v2756_v6, %v1031_v5 }
 0x153   : > { %v1040_v25 = vperm.slane %v1032_v39, %v2357_v49 }
 0x155   : > { %v1091_v1 = vrot.slane %v1040_v25, 4  ;;  %v2763_v8 = vsel %vm581_vm0, %v1089_v11, %v1040_v25  ;;  %v1315_v25 = vrot.slane %v1264_v31, 4 }
 0x157   : > { %565 = vperm.xlu1 %2055, %v554_v3   ;;  %1483 = vrot.lane.b32.xlu2 %v792_v14, %s2176_s17  ;;  %v2769_v18 = vsel %vm581_vm0, %v1052_v42, %v1091_v1  ;;  %v449_v3 = vpop.permute.xlu0 %448  ;;  %v1303_v1 = vrot.slane %v1260_v21, 4 }
 0x158   : > { %v1291_v23 = vrot.slane %v449_v3, 4 }
 0x159   : > { %v462_v46 = vpop.permute.xlu2 %461 }
 0x15f   : > { %1481 = vrot.lane.b32.xlu1 %v2503_v50, %s2176_s17 }
 0x161   : > { %v475_v42 = vpop.permute.xlu2 %474  ;;  %v423_v5 = vpop.permute.xlu1 %422 }
 0x162   : > { %v1289_v39 = vrot.slane %v475_v42, 4  ;;  %v1265_v11 = vrot.slane %v423_v5, 4  ;;  %v1268_v35 = vsel %vm581_vm0, %v423_v5, %v1267_v24  ;;  %v1292_v57 = vsel %vm581_vm0, %v475_v42, %v1291_v23 }
 0x163   : > { %v1276_v29 = vperm.slane %v1268_v35, %v2357_v49  ;;  %v1277_v35 = vrot.slane %v462_v46, 4 }
 0x164   : > { %v1290_v50 = vsel %vm581_vm0, %v1289_v39, %v449_v3  ;;  %v1266_v52 = vsel %vm581_vm0, %v1265_v11, %v2650_v17  ;;  %v1300_v3 = vperm.slane %v1292_v57, %v2357_v49 }
 0x165   : > { %v1272_v14 = vperm.slane %v1266_v52, %v2357_v49  ;;  %v1313_v55 = vrot.slane %v1276_v29, 4  ;;  %v1316_v22 = vsel %vm581_vm0, %v1276_v29, %v1315_v25  ;;  %v1296_v2 = vperm.slane %v1290_v50, %v2357_v49 }
 0x166   : > { %v1337_v50 = vrot.slane %v1300_v3, 4 }
 0x167   : > { %v1301_v32 = vrot.slane %v1272_v14, 4  ;;  %v1304_v24 = vsel %vm581_vm0, %v1272_v14, %v1303_v1  ;;  %v1314_v5 = vsel %vm581_vm0, %v1313_v55, %v1264_v31  ;;  %v1325_v52 = vrot.slane %v1296_v2, 4 }
 0x168   : > { %v1312_v25 = vperm.slane %v1304_v24, %v2410_v40 }
 0x169   : > { %v436_v39 = vpop.permute.xlu1 %435  ;;  %v1302_v17 = vsel %vm581_vm0, %v1301_v32, %v1260_v21  ;;  %v1320_v32 = vperm.slane %v1314_v5, %v2410_v40 }
 0x16a   : > { %v1278_v23 = vsel %vm581_vm0, %v1277_v35, %v436_v39  ;;  %v1279_v42 = vrot.slane %v436_v39, 4  ;;  %v1308_v11 = vperm.slane %v1302_v17, %v2410_v40  ;;  %v1324_v35 = vperm.slane %v1316_v22, %v2410_v40 }
 0x16b   : > { %v1284_v29 = vperm.slane %v1278_v23, %v2357_v49  ;;  %v1355_v23 = vrot.slane %v1312_v25, 4  ;;  %v1359_v5 = vrot.slane %v1320_v32, 4 }
 0x16c   : > { %v1280_v1 = vsel %vm581_vm0, %v462_v46, %v1279_v42  ;;  %v1351_v55 = vrot.slane %v1308_v11, 4 }
 0x16d   : > { %v1288_v31 = vperm.slane %v1280_v1, %v2357_v49  ;;  %v1326_v57 = vsel %vm581_vm0, %v1325_v52, %v1284_v29  ;;  %v1327_v14 = vrot.slane %v1284_v29, 4 }
 0x16e   : > { %v1332_v21 = vperm.slane %v1326_v57, %v2410_v40 }
 0x16f   : > { %v1339_v39 = vrot.slane %v1288_v31, 4  ;;  %v1328_v17 = vsel %vm581_vm0, %v1296_v2, %v1327_v14  ;;  %v1338_v24 = vsel %vm581_vm0, %v1337_v50, %v1288_v31  ;;  %v1363_v14 = vrot.slane %v1324_v35, 4 }
 0x170   : > { %v1349_v4 = vrot.slane %v1332_v21, 4  ;;  %v1336_v46 = vperm.slane %v1328_v17, %v2410_v40  ;;  %v2807_v42 = vsel %vm581_vm0, %v1332_v21, %v1351_v55  ;;  %v1344_v52 = vperm.slane %v1338_v24, %v2410_v40 }
 0x171   : > { %v1340_v29 = vsel %vm581_vm0, %v1300_v3, %v1339_v39  ;;  %v1055_v17 = vrot.slane %v2740_v27, 4 }
 0x172   : > { %v2812_v1 = vsel %vm581_vm0, %v1349_v4, %v1308_v11  ;;  %v1353_v22 = vrot.slane %v1336_v46, 4  ;;  %v2815_v2 = vsel %vm581_vm0, %v1336_v46, %v1355_v23  ;;  %v2818_v50 = vsel %vm581_vm0, %v1344_v52, %v1359_v5 }
 0x173   : > { %3228 = vst [vmem:[#allocation15_spill] sm:$0xff] %v2818_v50  ;;  %v1357_v31 = vrot.slane %v1344_v52, 4  ;;  %v1348_v57 = vperm.slane %v1340_v29, %v2410_v40  ;;  %v1041_v11 = vrot.slane %v2368_v60, 4  ;;  %v1029_v23 = vrot.slane %v2756_v6, 4  ;;  %v2844_v60 = vpop.permute.xlu2 %494 }
 0x174   : > { %v2822_v21 = vsel %vm581_vm0, %v1353_v22, %v1312_v25  ;;  %v1067_v6 = vrot.slane %v2754_v59, 4 }
 0x175   : > { %v2825_v55 = vsel %vm581_vm0, %v1357_v31, %v1320_v32  ;;  %v1361_v3 = vrot.slane %v1348_v57, 4  ;;  %v2828_v4 = vsel %vm581_vm0, %v1348_v57, %v1363_v14  ;;  %v1042_v25 = vsel %vm581_vm0, %v1041_v11, %v2743_v36 }
 0x176   : > { %3229 = vst [vmem:[#allocation16_spill] sm:$0xff] %v2825_v55  ;;  %v1030_v46 = vsel %vm581_vm0, %v1029_v23, %v2618_v44  ;;  %v2842_v52 = vperm.slane %v1042_v25, %v2357_v49  ;;  %v1100_v44 = vperm.slane %v2769_v18, %v2410_v40 }
 0x177   : > { %3230 = vst [vmem:[#allocation17_spill] sm:$0xff] %v2828_v4  ;;  %v2832_v39 = vsel %vm581_vm0, %v1361_v3, %v1324_v35  ;;  %v2847_v35 = vperm.slane %v1030_v46, %v2357_v49  ;;  %v743_v4 = vrot.slane %v2624_v51, 4  ;;  %v514_v51 = vpop.permute.xlu0 %513 }
 0x178   : > { %3231 = vst [vmem:[#allocation18_spill] sm:$0xff] %v2832_v39  ;;  %v1077_v36 = vrot.slane %v2842_v52, 4 }
 0x179   : > { %v456_v24 = vpop.permute.xlu1 %455 }
 0x17a   : > { %v1056_v32 = vsel %vm581_vm0, %v456_v24, %v1055_v17  ;;  %v1053_v29 = vrot.slane %v456_v24, 4  ;;  %v1078_v11 = vsel %vm581_vm0, %v1077_v36, %v2847_v35  ;;  %v1139_v36 = vrot.slane %v1100_v44, 4 }
 0x17b   : > { %v1064_v5 = vperm.slane %v1056_v32, %v2357_v49  ;;  %v1096_v32 = vperm.slane %v2763_v8, %v2410_v40  ;;  %v1084_v46 = vperm.slane %v1078_v11, %v2410_v40 }
 0x17c   : > { %v1054_v17 = vsel %vm581_vm0, %v1053_v29, %v2740_v27  ;;  %v508_v27 = vpop.permute.xlu2 %507 }
 0x17d   : > { %v1115_v14 = vrot.slane %v1064_v5, 4  ;;  %v2872_v29 = vperm.slane %v1054_v17, %v2357_v49  ;;  %v1135_v11 = vrot.slane %v1096_v32, 4 }
 0x181   : > { %v469_v22 = vpop.permute.xlu1 %468 }
 0x182   : > { %v1065_v31 = vrot.slane %v469_v22, 4  ;;  %v1068_v57 = vsel %vm581_vm0, %v469_v22, %v1067_v6  ;;  %v767_v22 = vrot.slane %v2634_v12, 4 }
 0x183   : > { %v1076_v3 = vperm.slane %v1068_v57, %v2357_v49 }
 0x184   : > { %v1066_v23 = vsel %vm581_vm0, %v1065_v31, %v2754_v59 }
 0x185   : > { %v2863_v24 = vperm.slane %v1066_v23, %v2357_v49  ;;  %v1113_v25 = vrot.slane %v1076_v3, 4  ;;  %v1116_v18 = vsel %vm581_vm0, %v1076_v3, %v1115_v14  ;;  %v768_v3 = vsel %vm581_vm0, %v2627_v16, %v767_v22 }
 0x186   : > { %v1124_v6 = vperm.slane %v1116_v18, %v2410_v40  ;;  %v1127_v23 = vrot.slane %v1084_v46, 4  ;;  %v2894_v16 = vperm.slane %v768_v3, %v2410_v40 }
 0x187   : > { %v1101_v59 = vrot.slane %v2863_v24, 4  ;;  %v1114_v31 = vsel %vm581_vm0, %v1113_v25, %v1064_v5 }
 0x188   : > { %v1120_v57 = vperm.slane %v1114_v31, %v2410_v40  ;;  %v2878_v8 = vsel %vm581_vm0, %v1124_v6, %v1139_v36  ;;  %v1137_v14 = vrot.slane %v1124_v6, 4 }
 0x189   : > { %v1102_v12 = vsel %vm581_vm0, %v1101_v59, %v2872_v29  ;;  %v527_v31 = vpop.permute.xlu2 %526 }
 0x18a   : > { %v1108_v17 = vperm.slane %v1102_v12, %v2410_v40  ;;  %v1133_v18 = vrot.slane %v1120_v57, 4  ;;  %v2887_v5 = vsel %vm581_vm0, %v1120_v57, %v1135_v11  ;;  %v2890_v25 = vsel %vm581_vm0, %v1137_v14, %v1100_v44 }
 0x18b   : > { %v744_v44 = vsel %vm581_vm0, %v2614_v62, %v743_v4  ;;  %v1365_v57 = vrot.slane %v514_v51, 4  ;;  %v793_v14 = vrot.slane %v2894_v16, 4  ;;  %v1377_v62 = vrot.slane %v527_v31, 4 }
 0x18c   : > { %v1125_v6 = vrot.slane %v1108_v17, 4  ;;  %v1128_v36 = vsel %vm581_vm0, %v1108_v17, %v1127_v23  ;;  %v2897_v22 = vsel %vm581_vm0, %v1133_v18, %v1096_v32  ;;  %v2907_v3 = vperm.slane %v744_v44, %v2410_v40 }
 0x18d   : > { %1485 = vrot.lane.b32.xlu1 %v1128_v36, %s2176_s17 }
 0x18e   : > { %v2901_v59 = vsel %vm581_vm0, %v1125_v6, %v1084_v46  ;;  %v794_v17 = vsel %vm581_vm0, %v793_v14, %v2907_v3 }
 0x191   : > { %v488_v12 = vpop.permute.xlu1 %487  ;;  %v2915_v4 = vpop.permute.xlu2 %539 }
 0x192   : > { %v1367_v11 = vrot.slane %v488_v12, 4  ;;  %v1366_v32 = vsel %vm581_vm0, %v1365_v57, %v488_v12 }
 0x193   : > { %v1372_v23 = vperm.slane %v1366_v32, %v2357_v49 }
 0x194   : > { %v1368_v46 = vsel %vm581_vm0, %v514_v51, %v1367_v11 }
 0x195   : > { %1499 = vrot.lane.b32.xlu1 %v794_v17, %s2175_s16  ;;  %v1376_v18 = vperm.slane %v1368_v46, %v2357_v49  ;;  %v1415_v39 = vrot.slane %v1372_v23, 4 }
 0x197   : > { %v1427_v12 = vrot.slane %v1376_v18, 4 }
 0x199   : > { %v501_v6 = vpop.permute.xlu1 %500 }
 0x19a   : > { %v1378_v36 = vsel %vm581_vm0, %v1377_v62, %v501_v6  ;;  %v1379_v44 = vrot.slane %v501_v6, 4 }
 0x19b   : > { %v1384_v57 = vperm.slane %v1378_v36, %v2357_v49 }
 0x19c   : > { %v1380_v14 = vsel %vm581_vm0, %v527_v31, %v1379_v44  ;;  %v1143_v31 = vrot.slane %v2383_v9, 4  ;;  %v1141_v44 = vrot.slane %v508_v27, 4 }
 0x19d   : > { %v1388_v17 = vperm.slane %v1380_v14, %v2357_v49  ;;  %v1413_v51 = vrot.slane %v1384_v57, 4  ;;  %1513 = vrot.lane.b32.xlu1 %v2493_v7, %s2177_s18  ;;  %v2925_v11 = vsel %vm581_vm0, %v1384_v57, %v1415_v39  ;;  %v1155_v39 = vrot.slane %v2844_v60, 4 }
 0x19e   : > { %v1144_v7 = vsel %vm581_vm0, %v508_v27, %v1143_v31  ;;  %v1142_v57 = vsel %vm581_vm0, %v1141_v44, %v2383_v9 }
 0x19f   : > { %v1425_v32 = vrot.slane %v1388_v17, 4  ;;  %v2928_v46 = vsel %vm581_vm0, %v1413_v51, %v1372_v23  ;;  %v2931_v62 = vsel %vm581_vm0, %v1388_v17, %v1427_v12  ;;  %v1152_v23 = vperm.slane %v1144_v7, %v2357_v49 }
 0x1a0   : > { %v1148_v58 = vperm.slane %v1142_v57, %v2357_v49 }
 0x1a1   : > { %v2934_v6 = vpop.permute.xlu2 %559  ;;  %v2937_v36 = vsel %vm581_vm0, %v1425_v32, %v1376_v18  ;;  %v1203_v32 = vrot.slane %v1152_v23, 4 }
 0x1a2   : > { %v1191_v48 = vrot.slane %v1148_v58, 4 }
 0x1a9   : > { %v573_v14 = vpop.permute.xlu2 %572  ;;  %v521_v12 = vpop.permute.xlu1 %520 }
 0x1aa   : > { %v1177_v17 = vrot.slane %v573_v14, 4  ;;  %v1153_v51 = vrot.slane %v521_v12, 4  ;;  %v1156_v15 = vsel %vm581_vm0, %v521_v12, %v1155_v39 }
 0x1ab   : > { %v1164_v18 = vperm.slane %v1156_v15, %v2357_v49  ;;  %v1165_v15 = vrot.slane %v2934_v6, 4 }
 0x1ac   : > { %v1178_v27 = vsel %vm581_vm0, %v1177_v17, %v2391_v19  ;;  %v1154_v31 = vsel %vm581_vm0, %v1153_v51, %v2844_v60  ;;  %v1103_v51 = vrot.slane %v2872_v29, 4  ;;  %v1079_v29 = vrot.slane %v2847_v35, 4 }
 0x1ad   : > { %v1160_v9 = vperm.slane %v1154_v31, %v2357_v49  ;;  %v1201_v44 = vrot.slane %v1164_v18, 4  ;;  %v2953_v7 = vsel %vm581_vm0, %v1164_v18, %v1203_v32  ;;  %v1184_v39 = vperm.slane %v1178_v27, %v2357_v49 }
 0x1af   : > { %v1189_v12 = vrot.slane %v1160_v9, 4  ;;  %v2957_v57 = vsel %vm581_vm0, %v1201_v44, %v1152_v23  ;;  %v1192_v60 = vsel %vm581_vm0, %v1160_v9, %v1191_v48  ;;  %v1213_v32 = vrot.slane %v1184_v39, 4 }
 0x1b0   : > { %v1200_v55 = vperm.slane %v1192_v60, %v2410_v40  ;;  %v1104_v23 = vsel %vm581_vm0, %v2863_v24, %v1103_v51 }
 0x1b1   : > { %v534_v43 = vpop.permute.xlu1 %533  ;;  %v1190_v17 = vsel %vm581_vm0, %v1189_v12, %v1148_v58  ;;  %v1112_v12 = vperm.slane %v1104_v23, %v2410_v40 }
 0x1b2   : > { %v1166_v31 = vsel %vm581_vm0, %v1165_v15, %v534_v43  ;;  %v1196_v18 = vperm.slane %v1190_v17, %v2410_v40  ;;  %v1167_v23 = vrot.slane %v534_v43, 4 }
 0x1b3   : > { %v1172_v27 = vperm.slane %v1166_v31, %v2357_v49  ;;  %v1243_v31 = vrot.slane %v1200_v55, 4 }
 0x1b4   : > { %v1239_v48 = vrot.slane %v1196_v18, 4 }
 0x1b5   : > { %v1215_v44 = vrot.slane %v1172_v27, 4  ;;  %v1214_v50 = vsel %vm581_vm0, %v1213_v32, %v1172_v27  ;;  %v1129_v32 = vrot.slane %v1112_v12, 4 }
 0x1b6   : > { %v1220_v58 = vperm.slane %v1214_v50, %v2410_v40  ;;  %v1080_v50 = vsel %vm581_vm0, %v2842_v52, %v1079_v29 }
 0x1b7   : > { %v1216_v9 = vsel %vm581_vm0, %v1184_v39, %v1215_v44  ;;  %v1088_v27 = vperm.slane %v1080_v50, %v2410_v40  ;;  %v1420_v50 = vperm.slane %v2928_v46, %v2410_v40 }
 0x1b8   : > { %v1240_v15 = vsel %vm581_vm0, %v1220_v58, %v1239_v48  ;;  %v1237_v17 = vrot.slane %v1220_v58, 4  ;;  %v1224_v60 = vperm.slane %v1216_v9, %v2410_v40  ;;  %v1179_v58 = vrot.slane %v2391_v19, 4  ;;  %v579_v48 = vpop.permute.xlu0 %578 }
 0x1b9   : > { %1487 = vrot.lane.b32.xlu2 %v1240_v15, %s2176_s17  ;;  %v1130_v44 = vsel %vm581_vm0, %v1129_v32, %v1088_v27  ;;  %v1401_v52 = vrot.slane %v579_v48, 4 }
 0x1ba   : > { %v1244_v24 = vsel %vm581_vm0, %v1224_v60, %v1243_v31  ;;  %v1241_v51 = vrot.slane %v1224_v60, 4  ;;  %v2982_v35 = vsel %vm581_vm0, %v1237_v17, %v1196_v18  ;;  %v1131_v18 = vrot.slane %v1088_v27, 4 }
 0x1bb   : > { %1519 = vrot.lane.b32.xlu1 %v1244_v24, %s2177_s18  ;;  %v1180_v15 = vsel %vm581_vm0, %v573_v14, %v1179_v58  ;;  %v795_v14 = vrot.slane %v2907_v3, 4  ;;  %v1391_v24 = vrot.slane %v2915_v4, 4 }
 0x1bc   : > { %v1242_v39 = vsel %vm581_vm0, %v1241_v51, %v1200_v55  ;;  %v1168_v55 = vsel %vm581_vm0, %v2934_v6, %v1167_v23  ;;  %v1132_v19 = vsel %vm581_vm0, %v1112_v12, %v1131_v18  ;;  %v1188_v17 = vperm.slane %v1180_v15, %v2357_v49 }
 0x1bd   : > { %1503 = vrot.lane.b32.xlu0 %v1242_v39, %s2175_s16  ;;  %v1176_v60 = vperm.slane %v1168_v55, %v2357_v49  ;;  %v1432_v39 = vperm.slane %v2937_v36, %v2410_v40  ;;  %v1424_v36 = vperm.slane %v2925_v11, %v2410_v40 }
 0x1be   : > { %v1225_v32 = vrot.slane %v1188_v17, 4 }
 0x1bf   : > { %v1227_v3 = vrot.slane %v1176_v60, 4  ;;  %v1471_v55 = vrot.slane %v1432_v39, 4 }
 0x1c0   : > { %v1226_v46 = vsel %vm581_vm0, %v1225_v32, %v1176_v60 }
 0x1c1   : > { %v553_v9 = vpop.permute.xlu1 %552  ;;  %1501 = vrot.lane.b32.xlu2 %v1130_v44, %s2175_s16  ;;  %v1232_v11 = vperm.slane %v1226_v46, %v2410_v40  ;;  %s1944_s16 = sshll.u32 %s2161_s9, 5 }
 0x1c2   : > { %v1403_v29 = vrot.slane %v553_v9, 4  ;;  %v1402_v31 = vsel %vm581_vm0, %v1401_v52, %v553_v9 }
 0x1c3   : > { %1533 = vrot.lane.b32.xlu1 %v2897_v22, %s2178_s22  ;;  %v796_v22 = vsel %vm581_vm0, %v2894_v16, %v795_v14  ;;  %v1408_v51 = vperm.slane %v1402_v31, %v2357_v49 }
 0x1c4   : > { %v1404_v43 = vsel %vm581_vm0, %v579_v48, %v1403_v29  ;;  %v1436_v48 = vperm.slane %v2931_v62, %v2410_v40 }
 0x1c5   : > { %1517 = vrot.lane.b32.xlu0 %v1132_v19, %s2177_s18  ;;  %v1412_v6 = vperm.slane %v1404_v43, %v2357_v49  ;;  %v1437_v9 = vrot.slane %v1408_v51, 4 }
 0x1c7   : > { %v1449_v44 = vrot.slane %v1412_v6, 4 }
 0x1c9   : > { %v566_v12 = vpop.permute.xlu1 %565  ;;  %1515 = vrot.lane.b32.xlu2 %v796_v22, %s2177_s18  ;;  %v1467_v22 = vrot.slane %v1424_v36, 4 }
 0x1ca   : > { %v1389_v27 = vrot.slane %v566_v12, 4  ;;  %v1392_v23 = vsel %vm581_vm0, %v566_v12, %v1391_v24  ;;  %v1475_v12 = vrot.slane %v1436_v48, 4 }
 0x1cb   : > { %v1400_v16 = vperm.slane %v1392_v23, %v2357_v49  ;;  %1547 = vrot.lane.b32.xlu1 %v2669_v47, %s2179_s23  ;;  %v1228_v47 = vsel %vm581_vm0, %v1188_v17, %v1227_v3 }
 0x1cc   : > { %v1390_v58 = vsel %vm581_vm0, %v1389_v27, %v2915_v4  ;;  %v1463_v4 = vrot.slane %v1420_v50, 4  ;;  %v1236_v14 = vperm.slane %v1228_v47, %v2410_v40 }
 0x1cd   : > { %v1396_v52 = vperm.slane %v1390_v58, %v2357_v49  ;;  %v1450_v29 = vsel %vm581_vm0, %v1449_v44, %v1400_v16  ;;  %v1451_v18 = vrot.slane %v1400_v16, 4  ;;  %1531 = vrot.lane.b32.xlu0 %v2677_v63, %s2178_s22  ;;  %v1245_v44 = vrot.slane %v1232_v11, 4 }
 0x1ce   : > { %v1456_v15 = vperm.slane %v1450_v29, %v2410_v40 }
 0x1cf   : > { %v1439_v43 = vrot.slane %v1396_v52, 4  ;;  %v1438_v62 = vsel %vm581_vm0, %v1437_v9, %v1396_v52  ;;  %v1452_v19 = vsel %vm581_vm0, %v1412_v6, %v1451_v18 }
 0x1d0   : > { %v1444_v49 = vperm.slane %v1438_v62, %v2410_v40  ;;  %v1469_v60 = vrot.slane %v1456_v15, 4  ;;  %v3034_v31 = vsel %vm581_vm0, %v1456_v15, %v1471_v55  ;;  %v1460_v63 = vperm.slane %v1452_v19, %v2410_v40  ;;  %v3239_v19 = vld [vmem:[#allocation10_spill] sm:$0xff] }
 0x1d1   : > { %v1482_v17 = vpop.permute.xlu1 %1481  ;;  %1529 = vrot.lane.b32.xlu2 %v2507_v34, %s2178_s22  ;;  %v1440_v24 = vsel %vm581_vm0, %v1408_v51, %v1439_v43  ;;  %v3238_v43 = vld [vmem:[#allocation9_spill] sm:$0xff] }
 0x1d2   : > { %v1718_v6 = vsel %vm1717_vm1, %v2526_v26, %v1482_v17  ;;  %v1464_v32 = vsel %vm581_vm0, %v1444_v49, %v1463_v4  ;;  %v1461_v3 = vrot.slane %v1444_v49, 4  ;;  %v1448_v27 = vperm.slane %v1440_v24, %v2410_v40  ;;  %v3237_v4 = vld [vmem:[#allocation8_spill] sm:$0xff] }
 0x1d3   : > { %1561 = vrot.lane.b32.xlu1 %v2511_v0, %s2180_s24  ;;  %v3047_v23 = vsel %vm581_vm0, %v1469_v60, %v1432_v39  ;;  %v3050_v34 = vsel %vm581_vm0, %v1460_v63, %v1475_v12  ;;  %v1473_v51 = vrot.slane %v1460_v63, 4  ;;  %v1208_v0 = vperm.slane %v2957_v57, %v2410_v40  ;;  %v3235_v57 = vld [vmem:[#allocation12_spill] sm:$0xff] }
 0x1d4   : > { %v1462_v16 = vsel %vm581_vm0, %v1461_v3, %v1420_v50  ;;  %v1465_v58 = vrot.slane %v1448_v27, 4  ;;  %v1468_v26 = vsel %vm581_vm0, %v1448_v27, %v1467_v22  ;;  %v1249_v39 = vrot.slane %v1236_v14, 4 }
 0x1d5   : > { %1545 = vrot.lane.b32.xlu0 %v2521_v37, %s2179_s23  ;;  %v3057_v46 = vsel %vm581_vm0, %v1473_v51, %v1436_v48  ;;  %v1246_v52 = vsel %vm581_vm0, %v1245_v44, %v1208_v0  ;;  %v1212_v50 = vperm.slane %v2953_v7, %v2410_v40  ;;  %v1247_v18 = vrot.slane %v1208_v0, 4  ;;  %v3234_v7 = vld [vmem:[#allocation14_spill] sm:$0xff]  ;;  %v3236_v48 = vld [vmem:[#allocation13_spill] sm:$0xff]  ;;  %v3242_v44 = vld [vmem:[#allocation11_spill] sm:$0xff] }
 0x1d6   : > { %v1466_v9 = vsel %vm581_vm0, %v1465_v58, %v1424_v36 }
 0x1d7   : > { %v1250_v29 = vsel %vm581_vm0, %v1249_v39, %v1212_v50  ;;  %v1248_v37 = vsel %vm581_vm0, %v1232_v11, %v1247_v18  ;;  %v1251_v40 = vrot.slane %v1212_v50, 4 }
 0x1d9   : > { %1535 = vrot.lane.b32.xlu2 %v1246_v52, %s2178_s22 }
 0x1db   : > { %1567 = vrot.lane.b32.xlu1 %v1250_v29, %s2180_s24 }
 0x1dd   : > { %1551 = vrot.lane.b32.xlu0 %v1248_v37, %s2179_s23 }
 0x1e1   : > { %1549 = vrot.lane.b32.xlu2 %v2887_v5, %s2179_s23  ;;  %v1252_v5 = vsel %vm581_vm0, %v1236_v14, %v1251_v40  ;;  %vm1808_vm0 = vcmask 261120   ;;  %s1833_s23 = scalar_lea.hbm %s3216_s1, %s1944_s16 }
 0x1e3   : > { %1581 = vrot.lane.b32.xlu1 %v2878_v8, %s2181_s25 }
 0x1e5   : > { %1565 = vrot.lane.b32.xlu0 %v2890_v25, %s2180_s24 }
 0x1e9   : > { %1563 = vrot.lane.b32.xlu2 %v2672_v61, %s2180_s24  ;;  %s1836_s24 = sshll.u32 %s1833_s23, 4  ;;  %s1837_s24 = int_to_ptr.hbm [resolvable:$true] %s1836_s24 }
 0x1eb   : > { %1595 = vrot.lane.b32.xlu1 %v2738_v20, %s2182_s26  ;;  %v1498_v20 = vpop.permute.xlu0 %1497 }
 0x1ed   : > { %1579 = vrot.lane.b32.xlu0 %v2662_v41, %s2181_s25 }
 0x1f1   : > { %1577 = vrot.lane.b32.xlu2 %v2534_v38, %s2181_s25  ;;  %v1484_v38 = vpop.permute.xlu2 %1483 }
 0x1f3   : > { %1609 = vrot.lane.b32.xlu1 %v2541_v28, %s2183_s27  ;;  %v1719_v28 = vsel %vm1717_vm1, %v2666_v30, %v1484_v38 }
 0x1f5   : > { %1593 = vrot.lane.b32.xlu0 %v2549_v13, %s2182_s26 }
 0x1f9   : > { %1583 = vrot.lane.b32.xlu2 %v1252_v5, %s2181_s25  ;;  %s1819_s25 = scalar_lea.sflag [#allocation4], %s2275_s5 }
 0x1fb   : > { %1615 = vrot.lane.b32.xlu1 %v1464_v32, %s2183_s27 }
 0x1fd   : > { %1599 = vrot.lane.b32.xlu0 %v1462_v16, %s2182_s26 }
 0x1ff   : > { %v1486_v8 = vpop.permute.xlu1 %1485 }
 0x200   : > { %v1720_v61 = vsel %vm1717_vm1, %v2901_v59, %v1486_v8  ;;  %v3233_v59 = vld [vmem:[#allocation16_spill] sm:$0xff] }
 0x201   : > { %1597 = vrot.lane.b32.xlu2 %v2812_v1, %s2182_s26  ;;  %s2101_s26 = sshra.s32 %s1837_s24, 4  ;;  %s2102_s26 = int_to_ptr.hbm [resolvable:$true] %s2101_s26 }
 0x202   : > { %p2108_p6 = scmp.lt.s32.totalorder %s2102_s26, %s3216_s1 }
 0x203   : > { %1629 = vrot.lane.b32.xlu1 %v2822_v21, %s2184_s28  ;;  %v1723_v21 = vsel %vm1722_vm2, %v1718_v6, %v1498_v20  ;;  %v3240_v6 = vld [vmem:[#allocation18_spill] sm:$0xff] }
 0x205   : > { %1613 = vrot.lane.b32.xlu0 %v2807_v42, %s2183_s27 }
 0x207   : > { %v1500_v13 = vpop.permute.xlu1 %1499 }
 0x208   : > { %v1724_v41 = vsel %vm1722_vm2, %v1719_v28, %v1500_v13 }
 0x209   : > { %1611 = vrot.lane.b32.xlu2 %v2729_v45, %s2183_s27  ;;  %s2103_s27 = scalar_lea.hbm %s2102_s26, 32 }
 0x20a   : > { %p2104_p3 = scmp.ne.s32.totalorder %s2102_s26, %s2103_s27 }
 0x20b   : > { %1643 = vrot.lane.b32.xlu1 %v2719_v53, %s2185_s29 }
 0x20c   : > { %p2105_p4 = pnand %p2104_p3, %p2253_p9 }
 0x20d   : > { %1627 = vrot.lane.b32.xlu0 %v2732_v56, %s2184_s28 }
 0x20e   : > { %p2106_p5 = pneg %p2105_p4 }
 0x20f   : > { %v1514_v1 = vpop.permute.xlu1 %1513 }
 0x210   : > { %v1728_v42 = vsel %vm1727_vm3, %v1723_v21, %v1514_v1 }
 0x211   : > { %1625 = vrot.lane.b32.xlu2 %v2564_v33, %s2184_s28  ;;  %v3232_v33 = vld [vmem:[#allocation15_spill] sm:$0xff] }
 0x213   : > { %v1488_v30 = vpop.permute.xlu2 %1487  ;;  %1657 = vrot.lane.b32.xlu1 %v2552_v54, %s2186_s30 }
 0x214   : > { %v1721_v45 = vsel %vm1717_vm1, %v2982_v35, %v1488_v30  ;;  %vm1813_vm1 = vcmask 523264  }
 0x215   : > { %1641 = vrot.lane.b32.xlu0 %v2555_v10, %s2185_s29 }
 0x219   : > { %1631 = vrot.lane.b32.xlu2 %v1466_v9, %s2184_s28 }
 0x21b   : > { %v1502_v53 = vpop.permute.xlu2 %1501  ;;  %1663 = vrot.lane.b32.xlu1 %v3047_v23, %s2186_s30  ;;  %v3241_v23 = vld [vmem:[#allocation17_spill] sm:$0xff] }
 0x21c   : > { %v1725_v56 = vsel %vm1722_vm2, %v1720_v61, %v1502_v53 }
 0x21d   : > { %1647 = vrot.lane.b32.xlu0 %v1468_v26, %s2185_s29 }
 0x221   : > { %1645 = vrot.lane.b32.xlu2 %v2815_v2, %s2185_s29  ;;  %s2107_s29 = scalar_lea.hbm %s3216_s1, 128 }
 0x222   : > { %p2109_p7 = scmp.lt.s32.totalorder %s2107_s29, %s2103_s27 }
 0x223   : > { %v1516_v25 = vpop.permute.xlu2 %1515  ;;  %1677 = vrot.lane.b32.xlu1 %v3232_v33, %s2187_s2 }
 0x224   : > { %v1729_v54 = vsel %vm1727_vm3, %v1724_v41, %v1516_v25  ;;  %p2110_p8 = por %p2109_p7, %p2108_p6 }
 0x225   : > { %1661 = vrot.lane.b32.xlu0 %v3233_v59, %s2186_s30 }
 0x226   : > { %p2111_p10 = pnand %p2110_p8, %p2106_p5 }
 0x229   : > { %1659 = vrot.lane.b32.xlu2 %v3234_v7, %s2186_s30 }
 0x22b   : > { %v1530_v10 = vpop.permute.xlu2 %1529  ;;  %1691 = vrot.lane.b32.xlu1 %v3235_v57, %s2188_s3 }
 0x22c   : > { %v1733_v35 = vsel %vm1732_vm4, %v1728_v42, %v1530_v10 }
 0x22d   : > { %v1520_v36 = vpop.permute.xlu1 %1519  ;;  %1675 = vrot.lane.b32.xlu0 %v3236_v48, %s2187_s2 }
 0x22f   : > { %v1504_v2 = vpop.permute.xlu0 %1503 }
 0x230   : > { %v1726_v47 = vsel %vm1722_vm2, %v1721_v45, %v1504_v2 }
 0x231   : > { %1673 = vrot.lane.b32.xlu2 %v3237_v4, %s2187_s2  ;;  %v1731_v15 = vsel %vm1727_vm3, %v1726_v47, %v1520_v36 }
 0x233   : > { %v1536_v55 = vpop.permute.xlu2 %1535  ;;  %1705 = vrot.lane.b32.xlu1 %v3238_v43, %s2189_s4 }
 0x234   : > { %v1736_v11 = vsel %vm1732_vm4, %v1731_v15, %v1536_v55 }
 0x235   : > { %v1534_v62 = vpop.permute.xlu1 %1533  ;;  %1689 = vrot.lane.b32.xlu0 %v3239_v19, %s2188_s3 }
 0x237   : > { %v1518_v49 = vpop.permute.xlu0 %1517 }
 0x238   : > { %v1730_v60 = vsel %vm1727_vm3, %v1725_v56, %v1518_v49 }
 0x239   : > { %1679 = vrot.lane.b32.xlu2 %v3034_v31, %s2187_s2  ;;  %v1735_v63 = vsel %vm1732_vm4, %v1730_v60, %v1534_v62 }
 0x23b   : > { %v1550_v17 = vpop.permute.xlu2 %1549  ;;  %1711 = vrot.lane.b32.xlu1 %v3050_v34, %s2189_s4 }
 0x23c   : > { %v1740_v14 = vsel %vm1737_vm5, %v1735_v63, %v1550_v17 }
 0x23d   : > { %v1548_v24 = vpop.permute.xlu1 %1547  ;;  %1695 = vrot.lane.b32.xlu0 %v3057_v46, %s2188_s3 }
 0x23f   : > { %v1532_v22 = vpop.permute.xlu0 %1531 }
 0x240   : > { %v1734_v12 = vsel %vm1732_vm4, %v1729_v54, %v1532_v22 }
 0x241   : > { %1693 = vrot.lane.b32.xlu2 %v3240_v6, %s2188_s3  ;;  %v1739_v32 = vsel %vm1737_vm5, %v1734_v12, %v1548_v24 }
 0x243   : > { %v1564_v31 = vpop.permute.xlu2 %1563 }
 0x244   : > { %v1744_v3 = vsel %vm1742_vm6, %v1739_v32, %v1564_v31 }
 0x245   : > { %v1562_v27 = vpop.permute.xlu1 %1561  ;;  %1709 = vrot.lane.b32.xlu0 %v3241_v23, %s2189_s4 }
 0x247   : > { %v1546_v34 = vpop.permute.xlu0 %1545 }
 0x248   : > { %v1738_v51 = vsel %vm1737_vm5, %v1733_v35, %v1546_v34 }
 0x249   : > { %1707 = vrot.lane.b32.xlu2 %v3242_v44, %s2189_s4  ;;  %v1743_v16 = vsel %vm1742_vm6, %v1738_v51, %v1562_v27 }
 0x24b   : > { %v1578_v58 = vpop.permute.xlu2 %1577 }
 0x24c   : > { %v1748_v26 = vsel %vm1747_vm7, %v1743_v16, %v1578_v58 }
 0x24d   : > { %v1568_v46 = vpop.permute.xlu1 %1567 }
 0x24f   : > { %v1552_v0 = vpop.permute.xlu0 %1551 }
 0x250   : > { %v1741_v39 = vsel %vm1737_vm5, %v1736_v11, %v1552_v0 }
 0x251   : > { %v1746_v9 = vsel %vm1742_vm6, %v1741_v39, %v1568_v46 }
 0x253   : > { %v1584_v52 = vpop.permute.xlu2 %1583 }
 0x254   : > { %v1751_v50 = vsel %vm1747_vm7, %v1746_v9, %v1584_v52 }
 0x255   : > { %v1582_v29 = vpop.permute.xlu1 %1581 }
 0x257   : > { %v1566_v18 = vpop.permute.xlu0 %1565 }
 0x258   : > { %v1745_v37 = vsel %vm1742_vm6, %v1740_v14, %v1566_v18 }
 0x259   : > { %v1750_v40 = vsel %vm1747_vm7, %v1745_v37, %v1582_v29 }
 0x25b   : > { %v1598_v5 = vpop.permute.xlu2 %1597 }
 0x25c   : > { %v1755_v8 = vsel %vm1752_vm8, %v1750_v40, %v1598_v5 }
 0x25d   : > { %v1596_v61 = vpop.permute.xlu1 %1595 }
 0x25f   : > { %v1580_v38 = vpop.permute.xlu0 %1579 }
 0x260   : > { %v1749_v48 = vsel %vm1747_vm7, %v1744_v3, %v1580_v38 }
 0x261   : > { %v1754_v47 = vsel %vm1752_vm8, %v1749_v48, %v1596_v61 }
 0x263   : > { %v1612_v28 = vpop.permute.xlu2 %1611 }
 0x264   : > { %v1759_v4 = vsel %vm1757_vm9, %v1754_v47, %v1612_v28 }
 0x265   : > { %v1610_v13 = vpop.permute.xlu1 %1609 }
 0x267   : > { %v1594_v41 = vpop.permute.xlu0 %1593 }
 0x268   : > { %v1753_v11 = vsel %vm1752_vm8, %v1748_v26, %v1594_v41 }
 0x269   : > { %v1758_v63 = vsel %vm1757_vm9, %v1753_v11, %v1610_v13 }
 0x26b   : > { %v1626_v20 = vpop.permute.xlu2 %1625 }
 0x26c   : > { %v1763_v17 = vsel %vm1762_vm10, %v1758_v63, %v1626_v20 }
 0x26d   : > { %v1616_v1 = vpop.permute.xlu1 %1615 }
 0x26f   : > { %v1600_v21 = vpop.permute.xlu0 %1599 }
 0x270   : > { %v1756_v6 = vsel %vm1752_vm8, %v1751_v50, %v1600_v21 }
 0x271   : > { %v1761_v34 = vsel %vm1757_vm9, %v1756_v6, %v1616_v1 }
 0x273   : > { %v1632_v42 = vpop.permute.xlu2 %1631 }
 0x274   : > { %v1766_v44 = vsel %vm1762_vm10, %v1761_v34, %v1632_v42 }
 0x275   : > { %v1630_v30 = vpop.permute.xlu1 %1629 }
 0x277   : > { %v1614_v45 = vpop.permute.xlu0 %1613 }
 0x278   : > { %v1760_v58 = vsel %vm1757_vm9, %v1755_v8, %v1614_v45 }
 0x279   : > { %v1765_v52 = vsel %vm1762_vm10, %v1760_v58, %v1630_v30 }
 0x27b   : > { %v1646_v53 = vpop.permute.xlu2 %1645 }
 0x27c   : > { %v1770_v29 = vsel %vm1767_vm12, %v1765_v52, %v1646_v53 }
 0x27d   : > { %v1644_v56 = vpop.permute.xlu1 %1643 }
 0x27f   : > { %v1628_v25 = vpop.permute.xlu0 %1627 }
 0x280   : > { %v1764_v15 = vsel %vm1762_vm10, %v1759_v4, %v1628_v25 }
 0x281   : > { %v1769_v62 = vsel %vm1767_vm12, %v1764_v15, %v1644_v56 }
 0x283   : > { %v1660_v33 = vpop.permute.xlu2 %1659 }
 0x284   : > { %v1774_v19 = vsel %vm1772_vm11, %v1769_v62, %v1660_v33 }
 0x285   : > { %v1658_v54 = vpop.permute.xlu1 %1657 }
 0x287   : > { %v1642_v59 = vpop.permute.xlu0 %1641 }
 0x288   : > { %v1768_v14 = vsel %vm1767_vm12, %v1763_v17, %v1642_v59 }
 0x289   : > { %v1773_v32 = vsel %vm1772_vm11, %v1768_v14, %v1658_v54 }
 0x28b   : > { %v1674_v7 = vpop.permute.xlu2 %1673 }
 0x28c   : > { %v1778_v3 = vsel %vm1777_vm13, %v1773_v32, %v1674_v7 }
 0x28d   : > { %v1664_v10 = vpop.permute.xlu1 %1663 }
 0x28f   : > { %v1648_v57 = vpop.permute.xlu0 %1647 }
 0x290   : > { %v1771_v16 = vsel %vm1767_vm12, %v1766_v44, %v1648_v57 }
 0x291   : > { %v1776_v26 = vsel %vm1772_vm11, %v1771_v16, %v1664_v10 }
 0x293   : > { %v1680_v35 = vpop.permute.xlu2 %1679 }
 0x294   : > { %v1781_v46 = vsel %vm1777_vm13, %v1776_v26, %v1680_v35 }
 0x295   : > { %v1678_v36 = vpop.permute.xlu1 %1677 }
 0x297   : > { %v1662_v2 = vpop.permute.xlu0 %1661 }
 0x298   : > { %v1775_v18 = vsel %vm1772_vm11, %v1770_v29, %v1662_v2 }
 0x299   : > { %v1780_v37 = vsel %vm1777_vm13, %v1775_v18, %v1678_v36 }
 0x29b   : > { %v1694_v55 = vpop.permute.xlu2 %1693 }
 0x29c   : > { %v1785_v40 = vsel %vm1782_vm15, %v1780_v37, %v1694_v55 }
 0x29d   : > { %v1692_v43 = vpop.permute.xlu1 %1691 }
 0x29f   : > { %v1676_v49 = vpop.permute.xlu0 %1675 }
 0x2a0   : > { %v1779_v60 = vsel %vm1777_vm13, %v1774_v19, %v1676_v49 }
 0x2a1   : > { %v1784_v22 = vsel %vm1782_vm15, %v1779_v60, %v1692_v43 }
 0x2a3   : > { %v1708_v24 = vpop.permute.xlu2 %1707 }
 0x2a4   : > { %v1789_v12 = vsel %vm1787_vm14, %v1784_v22, %v1708_v24 }
 0x2a5   : > { %1798 = vrot.lane.b32.xlu0 %v1789_v12, %s2190_s13  ;;  %v1706_v31 = vpop.permute.xlu1 %1705 }
 0x2a7   : > { %v1690_v27 = vpop.permute.xlu0 %1689 }
 0x2a8   : > { %v1783_v23 = vsel %vm1782_vm15, %v1778_v3, %v1690_v27 }
 0x2a9   : > { %v1788_v51 = vsel %vm1787_vm14, %v1783_v23, %v1706_v31 }
 0x2aa   : > { %1796 = vrot.lane.b32.xlu2 %v1788_v51, %s2190_s13 }
 0x2ad   : > { %v1712_v39 = vpop.permute.xlu1 %1711 }
 0x2af   : > { %v1696_v0 = vpop.permute.xlu0 %1695 }
 0x2b0   : > { %v1786_v9 = vsel %vm1782_vm15, %v1781_v46, %v1696_v0 }
 0x2b1   : > { %v1791_v50 = vsel %vm1787_vm14, %v1786_v9, %v1712_v39 }
 0x2b2   : > { %1802 = vrot.lane.b32.xlu2 %v1791_v50, %s2190_s13 }
 0x2b7   : > { %v1710_v5 = vpop.permute.xlu0 %1709 }
 0x2b8   : > { %v1790_v8 = vsel %vm1787_vm14, %v1785_v40, %v1710_v5 }
 0x2b9   : > { %1800 = vrot.lane.b32.xlu1 %v1790_v8, %s2190_s13 }
 0x304   : > { %v1797_v61 = vpop.permute.xlu2 %1796 }
 0x305   : > { %v1809_v38 = vsel %vm1808_vm0, %v1788_v51, %v1797_v61 }
 0x306   : > { %1814 = vst.msk [vmem:[%s155_s15] sm:$0xff] %vm1813_vm1, %v1809_v38 }
 0x30c   : > { %v1803_v28 = vpop.permute.xlu2 %1802 }
 0x30d   : > { %v1812_v13 = vsel %vm1808_vm0, %v1791_v50, %v1803_v28 }
 0x30e   : > { %1817 = vst.msk [vmem:[%s155_s15 + $0x18] sm:$0xff] %vm1813_vm1, %v1812_v13 }
 0x317   : > { %v1799_v41 = vpop.permute.xlu0 %1798 }
 0x318   : > { %v1810_v20 = vsel %vm1808_vm0, %v1789_v12, %v1799_v41 }
 0x319   : > { %1815 = vst.msk [vmem:[%s155_s15 + $0x8] sm:$0xff] %vm1813_vm1, %v1810_v20 }
 0x32b   : > { %v1801_v1 = vpop.permute.xlu1 %1800 }
 0x32c   : > { %v1811_v21 = vsel %vm1808_vm0, %v1790_v8, %v1801_v1 }
 0x32d   : > { %1816 = vst.msk [vmem:[%s155_s15 + $0x10] sm:$0xff] %vm1813_vm1, %v1811_v21 }
 0x32e   : > { %2114 = shalt.err (!%p2111_p10)
}
 0x32f   : > { %s2191_s5 = smov 128  }
 0x330   : > { %1947 = dma.vmem_to_hbm [thread:$0]  (%p2253_p9), %s1835_s12, 512, %s1837_s24, %s1819_s25, %s2191_s5, %s2191_s5, %s2178_s22  }
 0x331 PF: > { %p1958_p12 = scmp.ge.s32.totalorder %s2169_s11, 2  ;;  %s1851_s3 = sand.u32 1, %s2149_s6  }
 0x332   : > { %s1852_s4 = scalar_lea.sflag [#allocation4], %s1851_s3 }
 0x333   : > { %p1954_p13 = pnand %p1958_p12, %p2260_p11 }
 0x335   : > { %p1955_p0 = pneg %p1954_p13 }
 0x337   : > { %2144 = dma.done.wait (%p1955_p0), %s1852_s4, 512  }
 0x338   : > { %2146 = vsyncadd (%p1955_p0), %s1852_s4, 4294966784  ;;  %s17_s11 = sadd.s32 1, %s2169_s11   ;;  %s3243_s6 = smov %s2153_s7 }
 0x339   : > { %p14_p1 = scmp.ge.s32.totalorder %s17_s11, 6   ;;  %s3244_s7 = smov %s2157_s8 }
 0x33a   : > { %s3245_s8 = smov %s2258_s20  ;;  %s3246_s9 = smov %s2165_s10 }
 0x33b   : > { %s3247_s10 = smov %s3249_s14  ;;  %16 = sbr.rel (!%p14_p1) target bundleno = 6 (0x6), region = 69 }
 0x340   :  { %1858 = vsyncpa [#allocation3], 1 }
 0x341   :  { %1860 = vsyncpa [#allocation3 + $0x1], 1 }
 0x342   :  { %1861 = vsyncpa [#allocation4], 1 }
 0x343   :  { %1863 = vsyncpa [#allocation4 + $0x1], 1 }

</bundles_post_ra>
